<compile_context>
chip_gen: v7x
topology: tpu7x:2x2x1
jax: 0.10.0
libtpu: 0.0.40
codegen_flags: <defaults>
</compile_context>

<pallas_src>
import jax
import jax.numpy as jnp
from jax.experimental import pallas as pl
from jax.experimental.pallas import tpu as pltpu


def _cdiv(a, b):
    return -(-a // b)


def _default_pack_factor():
    """How many independent batch groups share one MXU pass (block-diag packing)."""
    try:
        kind = jax.devices()[0].device_kind.lower()
    except Exception:
        return 8
    # 128-wide MXU generations -> P*32 = 128; 256-wide MXU (v6e/v7x) -> P*32 = 256.
    if any(v in kind for v in ("v2", "v3", "v4", "v5")):
        return 4
    return 8


def _make_mlp_kernel(n_layers):
    """MLP kernel on packed activations: h is (P*d_i, cb) f32, batch along lanes."""

    def kernel(x_ref, *rest):
        # rest = (w0, b0, w1, b1, ..., w_{L-1}, b_{L-1}, out_ref)
        out_ref = rest[-1]
        wb = rest[:-1]

        h = x_ref[...]                         # (P*d_in, cb), packed & lane-dense
        for i in range(n_layers):
            w = wb[2 * i][...]                 # (P*d_{i+1}, P*d_i)  block-diagonal
            b = wb[2 * i + 1][...]             # (P*d_{i+1}, 1)
            # f32 operands; default Mosaic f32 matmul precision is sufficient here.
            h = jnp.dot(w, h, preferred_element_type=jnp.float32) + b
            if i < n_layers - 1:
                h = jnp.tanh(h)
        out_ref[...] = h.astype(out_ref.dtype)  # (P*d_out, cb), lane-dense store

    return kernel


def dnn_forward(x, lb, ub, params, *, max_tile_b=8192, pack_factor=None):
    """Forward pass of the DNN.

    x:      (N, d_in) float32
    lb, ub: (d_in,)   float32
    params: list of (W_i, b_i) with W_i shape (d_i, d_{i+1}), b_i shape (d_{i+1},)
            (same math as torch: h = h @ W_i + b_i)
    """
    x = x.astype(jnp.float32)
    N, d_in = x.shape
    n_layers = len(params)
    d_out = params[-1][0].shape[1]

    P = max(1, int(pack_factor) if pack_factor is not None else _default_pack_factor())

    # ---- batch tiling: multiples of 128*P, >=2 grid steps when possible --------
    step = 128 * P
    n_units = _cdiv(N, step)
    max_units = max(1, int(max_tile_b) // step)
    units_per_tile = min(max_units, max(1, _cdiv(n_units, 2)))
    tile_b = units_per_tile * step
    N_pad = _cdiv(N, tile_b) * tile_b
    grid = (N_pad // tile_b,)
    cb = tile_b // P            # lane width of each packed block (multiple of 128)
    Np = N_pad // P             # total packed batch columns

    # ---- fold normalization (x*scale + shift) into layer 0 ---------------------
    lb_f = lb.reshape(-1).astype(jnp.float32)
    ub_f = ub.reshape(-1).astype(jnp.float32)
    scale = 2.0 / (ub_f - lb_f)                     # (d_in,)
    shift = -(2.0 * lb_f / (ub_f - lb_f) + 1.0)     # (d_in,)

    # ---- build block-diagonal (packed) weights, all VMEM-resident --------------
    eye_p = jnp.eye(P, dtype=jnp.float32)
    flat_wb = []
    wb_specs = []
    for idx, (w, b) in enumerate(params):
        w = w.astype(jnp.float32)                   # (d_i, d_{i+1})
        b = b.astype(jnp.float32)                   # (d_{i+1},)
        if idx == 0:
            b = shift @ w + b                       # fold normalization shift
            w = scale[:, None] * w                  # fold normalization scale
        wt = w.T                                    # (d_{i+1}, d_i)
        w_bd = jnp.kron(eye_p, wt)                  # (P*d_{i+1}, P*d_i)
        b_bd = jnp.tile(b, P).reshape(-1, 1)        # (P*d_{i+1}, 1)
        flat_wb += [w_bd, b_bd]
        wb_specs += [
            pl.BlockSpec(w_bd.shape, lambda i: (0, 0)),   # full weight, resident
            pl.BlockSpec(b_bd.shape, lambda i: (0, 0)),   # full bias, resident
        ]

    # ---- pack the input: (N_pad, d_in) -> (P*d_in, N_pad/P) --------------------
    if N_pad != N:
        x = jnp.pad(x, ((0, N_pad - N), (0, 0)))
    x_p = x.reshape(P, Np, d_in).transpose(0, 2, 1).reshape(P * d_in, Np)

    # ---- advisory cost estimate -------------------------------------------------
    dims = [params[0][0].shape[0]] + [w.shape[1] for (w, _) in params]
    flops = 2 * N_pad * sum(dims[i] * dims[i + 1] for i in range(n_layers))
    transcendentals = N_pad * sum(dims[1:-1])
    bytes_accessed = 4 * (N_pad * d_in + N_pad * d_out + sum(int(a.size) for a in flat_wb))
    cost = pl.CostEstimate(
        flops=int(flops),
        transcendentals=int(transcendentals),
        bytes_accessed=int(bytes_accessed),
    )

    out_p = pl.pallas_call(
        _make_mlp_kernel(n_layers),
        out_shape=jax.ShapeDtypeStruct((P * d_out, Np), jnp.float32),
        grid_spec=pltpu.PrefetchScalarGridSpec(
            num_scalar_prefetch=0,
            grid=grid,
            in_specs=[pl.BlockSpec((P * d_in, cb), lambda i: (0, i))] + wb_specs,
            out_specs=pl.BlockSpec((P * d_out, cb), lambda i: (0, i)),
        ),
        compiler_params=pltpu.CompilerParams(
            dimension_semantics=("parallel",),          # megacore sharding on v7x
            vmem_limit_bytes=32 * 1024 * 1024,          # safe on v5e/v6e/v7x
        ),
        cost_estimate=cost,
    )(x_p, *flat_wb)

    # ---- unpack: (P*d_out, N_pad/P) -> (N, d_out) --------------------------------
    out = out_p.reshape(P, d_out, Np).transpose(0, 2, 1).reshape(N_pad, d_out)
    return out[:N]


def init_params(layers, key):
    """Deterministic init matching torch.nn.Linear default (U(-1/sqrt(fan_in), ...))."""
    params = []
    for i in range(len(layers) - 1):
        fan_in, fan_out = layers[i], layers[i + 1]
        key, kw, kb = jax.random.split(key, 3)
        bound = 1.0 / jnp.sqrt(fan_in)
        w = jax.random.uniform(kw, (fan_in, fan_out), jnp.float32, -bound, bound)
        b = jax.random.uniform(kb, (fan_out,), jnp.float32, -bound, bound)
        params.append((w, b))
    return params


def dnn_forward_ref(x, lb, ub, params):
    h = 2.0 * (x - lb) / (ub - lb) - 1.0
    n = len(params)
    for i, (w, b) in enumerate(params):
        h = h @ w + b
        if i < n - 1:
            h = jnp.tanh(h)
    return h


if __name__ == "__main__":
    # Small PINN-style network: [2, 32, 32, 32, 1]
    layers = [2, 32, 32, 32, 1]

    key = jax.random.PRNGKey(0)
    key, kx1, kx2, kx3 = jax.random.split(key, 4)

    lb = jnp.array([0.0, 0.0], dtype=jnp.float32)
    ub = jnp.array([1.0, 0.08], dtype=jnp.float32)

    params = init_params(layers, key)

    # Test 1: tiny batch (single grid step, heavy padding path, default pack factor).
    N1 = 8
    x1 = lb + jax.random.uniform(kx1, (N1, 2), jnp.float32) * (ub - lb)
    out1 = jax.block_until_ready(dnn_forward(x1, lb, ub, params))
    ref1 = dnn_forward_ref(x1, lb, ub, params)
    assert out1.shape == (N1, 1)
    assert jnp.allclose(out1, ref1, atol=1e-5, rtol=1e-5), "mismatch vs reference (N=8)"

    # Test 2: ragged batch with a small explicit pack factor / tile -> multi-step grid.
    N2 = 1000
    x2 = lb + jax.random.uniform(kx2, (N2, 2), jnp.float32) * (ub - lb)
    out2 = jax.block_until_ready(
        dnn_forward(x2, lb, ub, params, max_tile_b=512, pack_factor=2))
    ref2 = dnn_forward_ref(x2, lb, ub, params)
    assert out2.shape == (N2, 1)
    assert jnp.allclose(out2, ref2, atol=1e-5, rtol=1e-5), "mismatch vs reference (N=1000)"

    # Test 3: larger ragged batch, default (generation-aware) pack factor, multi-step grid.
    N3 = 5000
    x3 = lb + jax.random.uniform(kx3, (N3, 2), jnp.float32) * (ub - lb)
    out3 = jax.block_until_ready(dnn_forward(x3, lb, ub, params))
    ref3 = dnn_forward_ref(x3, lb, ub, params)
    assert out3.shape == (N3, 1)
    assert jnp.allclose(out3, ref3, atol=1e-5, rtol=1e-5), "mismatch vs reference (N=5000)"

    print("KERNEL_OK")
</pallas_src>

<mosaic_0001>
module attributes {stable_mosaic.version = 11 : i64} {
  func.func @kernel(%arg0: i32, %arg1: memref<16x128xf32, #tpu.memory_space<vmem>>, %arg2: memref<256x16xf32, #tpu.memory_space<vmem>>, %arg3: memref<256x1xf32, #tpu.memory_space<vmem>>, %arg4: memref<256x256xf32, #tpu.memory_space<vmem>>, %arg5: memref<256x1xf32, #tpu.memory_space<vmem>>, %arg6: memref<256x256xf32, #tpu.memory_space<vmem>>, %arg7: memref<256x1xf32, #tpu.memory_space<vmem>>, %arg8: memref<8x256xf32, #tpu.memory_space<vmem>>, %arg9: memref<8x1xf32, #tpu.memory_space<vmem>>, %arg10: memref<8x128xf32, #tpu.memory_space<vmem>>) attributes {dimension_semantics = [#tpu.dimension_semantics<parallel>], iteration_bounds = array<i64: 1>, scalar_prefetch = 0 : i64, scratch_operands = 0 : i64, tpu.core_type = #tpu.core_type<tc>, window_params = [{transform_indices = @transform_0, window_bounds = array<i64: 16, 128>}, {pipeline_mode = #tpu.pipeline_mode<synchronous>, transform_indices = @transform_1, window_bounds = array<i64: 256, 16>}, {pipeline_mode = #tpu.pipeline_mode<synchronous>, transform_indices = @transform_2, window_bounds = array<i64: 256, 1>}, {pipeline_mode = #tpu.pipeline_mode<synchronous>, transform_indices = @transform_3, window_bounds = array<i64: 256, 256>}, {pipeline_mode = #tpu.pipeline_mode<synchronous>, transform_indices = @transform_4, window_bounds = array<i64: 256, 1>}, {pipeline_mode = #tpu.pipeline_mode<synchronous>, transform_indices = @transform_5, window_bounds = array<i64: 256, 256>}, {pipeline_mode = #tpu.pipeline_mode<synchronous>, transform_indices = @transform_6, window_bounds = array<i64: 256, 1>}, {pipeline_mode = #tpu.pipeline_mode<synchronous>, transform_indices = @transform_7, window_bounds = array<i64: 8, 256>}, {pipeline_mode = #tpu.pipeline_mode<synchronous>, transform_indices = @transform_8, window_bounds = array<i64: 8, 1>}, {transform_indices = @transform_9, window_bounds = array<i64: 8, 128>}]} {
    %c0 = arith.constant 0 : index
    %c0_0 = arith.constant 0 : index
    %0 = vector.load %arg1[%c0, %c0_0] : memref<16x128xf32, #tpu.memory_space<vmem>>, vector<16x128xf32>
    %c0_1 = arith.constant 0 : index
    %c0_2 = arith.constant 0 : index
    %1 = vector.load %arg2[%c0_1, %c0_2] : memref<256x16xf32, #tpu.memory_space<vmem>>, vector<256x16xf32>
    %c0_3 = arith.constant 0 : index
    %c0_4 = arith.constant 0 : index
    %2 = vector.load %arg3[%c0_3, %c0_4] : memref<256x1xf32, #tpu.memory_space<vmem>>, vector<256x1xf32>
    %cst = arith.constant dense<0.000000e+00> : vector<256x128xf32>
    %3 = tpu.matmul %1, %0, %cst {dimension_numbers = #tpu.dot_dimension_numbers<[1], [0], [0], [1], [0, 0, 1, 1], [], []>} : vector<256x16xf32>, vector<16x128xf32>, vector<256x128xf32> -> vector<256x128xf32>
    %4 = vector.broadcast %2 : vector<256x1xf32> to vector<256x128xf32>
    %5 = arith.addf %3, %4 : vector<256x128xf32>
    %6 = math.tanh %5 : vector<256x128xf32>
    %c0_5 = arith.constant 0 : index
    %c0_6 = arith.constant 0 : index
    %7 = vector.load %arg4[%c0_5, %c0_6] : memref<256x256xf32, #tpu.memory_space<vmem>>, vector<256x256xf32>
    %c0_7 = arith.constant 0 : index
    %c0_8 = arith.constant 0 : index
    %8 = vector.load %arg5[%c0_7, %c0_8] : memref<256x1xf32, #tpu.memory_space<vmem>>, vector<256x1xf32>
    %cst_9 = arith.constant dense<0.000000e+00> : vector<256x128xf32>
    %9 = tpu.matmul %7, %6, %cst_9 {dimension_numbers = #tpu.dot_dimension_numbers<[1], [0], [0], [1], [0, 0, 1, 1], [], []>} : vector<256x256xf32>, vector<256x128xf32>, vector<256x128xf32> -> vector<256x128xf32>
    %10 = vector.broadcast %8 : vector<256x1xf32> to vector<256x128xf32>
    %11 = arith.addf %9, %10 : vector<256x128xf32>
    %12 = math.tanh %11 : vector<256x128xf32>
    %c0_10 = arith.constant 0 : index
    %c0_11 = arith.constant 0 : index
    %13 = vector.load %arg6[%c0_10, %c0_11] : memref<256x256xf32, #tpu.memory_space<vmem>>, vector<256x256xf32>
    %c0_12 = arith.constant 0 : index
    %c0_13 = arith.constant 0 : index
    %14 = vector.load %arg7[%c0_12, %c0_13] : memref<256x1xf32, #tpu.memory_space<vmem>>, vector<256x1xf32>
    %cst_14 = arith.constant dense<0.000000e+00> : vector<256x128xf32>
    %15 = tpu.matmul %13, %12, %cst_14 {dimension_numbers = #tpu.dot_dimension_numbers<[1], [0], [0], [1], [0, 0, 1, 1], [], []>} : vector<256x256xf32>, vector<256x128xf32>, vector<256x128xf32> -> vector<256x128xf32>
    %16 = vector.broadcast %14 : vector<256x1xf32> to vector<256x128xf32>
    %17 = arith.addf %15, %16 : vector<256x128xf32>
    %18 = math.tanh %17 : vector<256x128xf32>
    %c0_15 = arith.constant 0 : index
    %c0_16 = arith.constant 0 : index
    %19 = vector.load %arg8[%c0_15, %c0_16] : memref<8x256xf32, #tpu.memory_space<vmem>>, vector<8x256xf32>
    %c0_17 = arith.constant 0 : index
    %c0_18 = arith.constant 0 : index
    %20 = vector.load %arg9[%c0_17, %c0_18] : memref<8x1xf32, #tpu.memory_space<vmem>>, vector<8x1xf32>
    %cst_19 = arith.constant dense<0.000000e+00> : vector<8x128xf32>
    %21 = tpu.matmul %19, %18, %cst_19 {dimension_numbers = #tpu.dot_dimension_numbers<[1], [0], [0], [1], [0, 0, 1, 1], [], []>} : vector<8x256xf32>, vector<256x128xf32>, vector<8x128xf32> -> vector<8x128xf32>
    %22 = vector.broadcast %20 : vector<8x1xf32> to vector<8x128xf32>
    %23 = arith.addf %21, %22 : vector<8x128xf32>
    %c0_20 = arith.constant 0 : index
    %c0_21 = arith.constant 0 : index
    %24 = vector.load %arg10[%c0_20, %c0_21] : memref<8x128xf32, #tpu.memory_space<vmem>>, vector<8x128xf32>
    tpu.vector_store %arg10[%c0_20, %c0_21], %23 {strides = array<i32>} : memref<8x128xf32, #tpu.memory_space<vmem>>, vector<8x128xf32>,
    return
  }
  func.func @transform_0(%arg0: i32) -> (i32, i32) {
    %c0_i32 = arith.constant 0 : i32
    %c0_i32_0 = arith.constant 0 : i32
    return %c0_i32, %arg0 : i32, i32
  }
  func.func @transform_1(%arg0: i32) -> (i32, i32) {
    %c0_i32 = arith.constant 0 : i32
    %c0_i32_0 = arith.constant 0 : i32
    %c0_i32_1 = arith.constant 0 : i32
    return %c0_i32, %c0_i32_0 : i32, i32
  }
  func.func @transform_2(%arg0: i32) -> (i32, i32) {
    %c0_i32 = arith.constant 0 : i32
    %c0_i32_0 = arith.constant 0 : i32
    %c0_i32_1 = arith.constant 0 : i32
    return %c0_i32, %c0_i32_0 : i32, i32
  }
  func.func @transform_3(%arg0: i32) -> (i32, i32) {
    %c0_i32 = arith.constant 0 : i32
    %c0_i32_0 = arith.constant 0 : i32
    %c0_i32_1 = arith.constant 0 : i32
    return %c0_i32, %c0_i32_0 : i32, i32
  }
  func.func @transform_4(%arg0: i32) -> (i32, i32) {
    %c0_i32 = arith.constant 0 : i32
    %c0_i32_0 = arith.constant 0 : i32
    %c0_i32_1 = arith.constant 0 : i32
    return %c0_i32, %c0_i32_0 : i32, i32
  }
  func.func @transform_5(%arg0: i32) -> (i32, i32) {
    %c0_i32 = arith.constant 0 : i32
    %c0_i32_0 = arith.constant 0 : i32
    %c0_i32_1 = arith.constant 0 : i32
    return %c0_i32, %c0_i32_0 : i32, i32
  }
  func.func @transform_6(%arg0: i32) -> (i32, i32) {
    %c0_i32 = arith.constant 0 : i32
    %c0_i32_0 = arith.constant 0 : i32
    %c0_i32_1 = arith.constant 0 : i32
    return %c0_i32, %c0_i32_0 : i32, i32
  }
  func.func @transform_7(%arg0: i32) -> (i32, i32) {
    %c0_i32 = arith.constant 0 : i32
    %c0_i32_0 = arith.constant 0 : i32
    %c0_i32_1 = arith.constant 0 : i32
    return %c0_i32, %c0_i32_0 : i32, i32
  }
  func.func @transform_8(%arg0: i32) -> (i32, i32) {
    %c0_i32 = arith.constant 0 : i32
    %c0_i32_0 = arith.constant 0 : i32
    %c0_i32_1 = arith.constant 0 : i32
    return %c0_i32, %c0_i32_0 : i32, i32
  }
  func.func @transform_9(%arg0: i32) -> (i32, i32) {
    %c0_i32 = arith.constant 0 : i32
    %c0_i32_0 = arith.constant 0 : i32
    return %c0_i32, %arg0 : i32, i32
  }
}

</mosaic_0001>

<bundles_post_ra>
// kernel: tpu_custom_call.1
= control target key start
LH: loop header
LB: loop body
LE: loop exit
PB: predicated region body
PF: predicated region fallthrough
CT: control target
= control target key end

     0   :  { %vm259_vm0 = vcmask 130048   ;;  %v2238_v3 = vmov 0   ;;  %s3270_s0 = inlined_call_operand.vmem [shape: f32[16,128], index: 0, kind: input, shape index: {}]   ;;  %s3271_s1 = inlined_call_operand.vmem [shape: f32[256,16], index: 1, kind: input, shape index: {}]   ;;  %s3272_s2 = inlined_call_operand.vmem [shape: f32[256,1], index: 2, kind: input, shape index: {}]   ;;  %s3273_s3 = inlined_call_operand.vmem [shape: f32[256,256], index: 3, kind: input, shape index: {}]   ;;  %s3274_s4 = inlined_call_operand.vmem [shape: f32[256,1], index: 4, kind: input, shape index: {}]   ;;  %s3275_s5 = inlined_call_operand.vmem [shape: f32[256,256], index: 5, kind: input, shape index: {}]   ;;  %s3276_s6 = inlined_call_operand.vmem [shape: f32[256,1], index: 6, kind: input, shape index: {}]   ;;  %s3277_s7 = inlined_call_operand.vmem [shape: f32[8,256], index: 7, kind: input, shape index: {}]   ;;  %s3278_s8 = inlined_call_operand.vmem [shape: f32[8,1], index: 8, kind: input, shape index: {}]   ;;  %s3279_s9 = inlined_call_operand.hbm [shape: f32[8,128], index: 9, kind: output, shape index: {}]  }
   0x1   :  { %v69_v0 = vld [vmem:[%s3272_s2 + $0x10] sm:$0xff]  ;;  %v67_v1 = vld [vmem:[%s3272_s2] sm:$0xff]  ;;  %2021 = vset.pattern.permute.xlu1 %v2238_v3  ;;  %2020 = vset.pattern.permute.xlu0 %v2238_v3  ;;  %v34_v4 = vld [vmem:[%s3270_s0 + $0x8] sm:$0xff] }
   0x2   :  { %v33_v2 = vld [vmem:[%s3270_s0] sm:$0xff]  ;;  %111 = vperm.xlu1 %2021, %v69_v0   ;;  %101 = vperm.xlu0 %2020, %v67_v1   ;;  %v70_v7 = vld [vmem:[%s3272_s2 + $0x18] sm:$0xff]  ;;  %v68_v8 = vld [vmem:[%s3272_s2 + $0x8] sm:$0xff] }
   0x3   :  { %v1885_v5 = vpack.c.bf16 %v34_v4, %v33_v2  ;;  %v35_v6 = vld [vmem:[%s3271_s1] sm:$0xff]  ;;  %v36_v9 = vld [vmem:[%s3271_s1 + $0x8] sm:$0xff]  ;;  %v37_v10 = vld [vmem:[%s3271_s1 + $0x10] sm:$0xff] }
   0x4   :  { %1837 = vmatprep.mubr.msk.f32.mxu0 %vm259_vm0, %v35_v6  ;;  %v72_v11 = vld [vmem:[%s3272_s2 + $0x28] sm:$0xff]  ;;  %v71_v12 = vld [vmem:[%s3272_s2 + $0x20] sm:$0xff]  ;;  %v38_v13 = vld [vmem:[%s3271_s1 + $0x18] sm:$0xff] }
   0x5   :  { %1886 = vmatprep.subr.bf16.mxu0 %v1885_v5  ;;  %v39_v14 = vld [vmem:[%s3271_s1 + $0x20] sm:$0xff]  ;;  %v74_v15 = vld [vmem:[%s3272_s2 + $0x38] sm:$0xff]  ;;  %v73_v16 = vld [vmem:[%s3272_s2 + $0x30] sm:$0xff] }
   0x6   :  { %1888 = vmatpush3.bf16.msra.mxu0 %v1885_v5  ;;  %116 = vperm.xlu1 %2021, %v70_v7   ;;  %v40_v17 = vld [vmem:[%s3271_s1 + $0x28] sm:$0xff]  ;;  %v41_v18 = vld [vmem:[%s3271_s1 + $0x30] sm:$0xff]  ;;  %v75_v20 = vld [vmem:[%s3272_s2 + $0x40] sm:$0xff] }
   0x7   :  { %106 = vperm.xlu0 %2020, %v68_v8   ;;  %v76_v19 = vld [vmem:[%s3272_s2 + $0x48] sm:$0xff]  ;;  %v42_v21 = vld [vmem:[%s3271_s1 + $0x38] sm:$0xff]  ;;  %v43_v22 = vld [vmem:[%s3271_s1 + $0x40] sm:$0xff] }
   0x8   :  { %v78_v23 = vld [vmem:[%s3272_s2 + $0x58] sm:$0xff]  ;;  %v77_v24 = vld [vmem:[%s3272_s2 + $0x50] sm:$0xff]  ;;  %v44_v25 = vld [vmem:[%s3271_s1 + $0x48] sm:$0xff] }
   0x9   :  { %1838 = vmatmul.mubr.msk.f32.vlgmr.msra.gmra.mrb[0].mxu0 %vm259_vm0, %v36_v9  ;;  %v45_v26 = vld [vmem:[%s3271_s1 + $0x50] sm:$0xff]  ;;  %v80_v27 = vld [vmem:[%s3272_s2 + $0x68] sm:$0xff]  ;;  %v79_v28 = vld [vmem:[%s3272_s2 + $0x60] sm:$0xff] }
   0xa   :  { %1840 = vmatprep.mubr.msk.f32.mxu0 %vm259_vm0, %v37_v10  ;;  %126 = vperm.xlu1 %2021, %v72_v11   ;;  %v46_v29 = vld [vmem:[%s3271_s1 + $0x58] sm:$0xff]  ;;  %v47_v30 = vld [vmem:[%s3271_s1 + $0x60] sm:$0xff]  ;;  %v81_v32 = vld [vmem:[%s3272_s2 + $0x70] sm:$0xff] }
   0xb   :  { %121 = vperm.xlu0 %2020, %v71_v12   ;;  %v82_v31 = vld [vmem:[%s3272_s2 + $0x78] sm:$0xff]  ;;  %v48_v33 = vld [vmem:[%s3271_s1 + $0x68] sm:$0xff]  ;;  %v49_v34 = vld [vmem:[%s3271_s1 + $0x70] sm:$0xff] }
   0xc   :  { %v84_v35 = vld [vmem:[%s3272_s2 + $0x88] sm:$0xff]  ;;  %v83_v36 = vld [vmem:[%s3272_s2 + $0x80] sm:$0xff]  ;;  %v50_v37 = vld [vmem:[%s3271_s1 + $0x78] sm:$0xff] }
   0xd   :  { %1841 = vmatmul.mubr.msk.f32.gmra.mrb[2].mxu0 %vm259_vm0, %v38_v13  ;;  %v51_v38 = vld [vmem:[%s3271_s1 + $0x80] sm:$0xff]  ;;  %v86_v39 = vld [vmem:[%s3272_s2 + $0x98] sm:$0xff]  ;;  %v85_v40 = vld [vmem:[%s3272_s2 + $0x90] sm:$0xff] }
   0xe   :  { %1843 = vmatprep.mubr.msk.f32.mxu0 %vm259_vm0, %v39_v14  ;;  %136 = vperm.xlu1 %2021, %v74_v15   ;;  %v52_v41 = vld [vmem:[%s3271_s1 + $0x88] sm:$0xff]  ;;  %v53_v42 = vld [vmem:[%s3271_s1 + $0x90] sm:$0xff]  ;;  %v87_v44 = vld [vmem:[%s3272_s2 + $0xa0] sm:$0xff] }
   0xf   :  { %131 = vperm.xlu0 %2020, %v73_v16   ;;  %v88_v43 = vld [vmem:[%s3272_s2 + $0xa8] sm:$0xff] }
  0x11   :  { %1844 = vmatmul.mubr.msk.f32.gmra.mrb[4].mxu0 %vm259_vm0, %v40_v17 }
  0x12   :  { %1846 = vmatprep.mubr.msk.f32.mxu0 %vm259_vm0, %v41_v18  ;;  %146 = vperm.xlu1 %2021, %v76_v19  }
  0x13   :  { %141 = vperm.xlu0 %2020, %v75_v20  }
  0x15   :  { %1847 = vmatmul.mubr.msk.f32.gmra.mrb[6].mxu0 %vm259_vm0, %v42_v21 }
  0x16   :  { %1849 = vmatprep.mubr.msk.f32.mxu0 %vm259_vm0, %v43_v22  ;;  %156 = vperm.xlu1 %2021, %v78_v23  }
  0x17   :  { %151 = vperm.xlu0 %2020, %v77_v24  }
  0x19   :  { %1850 = vmatmul.mubr.msk.f32.gmra.mrb[8].mxu0 %vm259_vm0, %v44_v25 }
  0x1a   :  { %1852 = vmatprep.mubr.msk.f32.mxu0 %vm259_vm0, %v45_v26  ;;  %166 = vperm.xlu1 %2021, %v80_v27  }
  0x1b   :  { %161 = vperm.xlu0 %2020, %v79_v28  }
  0x1d   :  { %1853 = vmatmul.mubr.msk.f32.gmra.mrb[10].mxu0 %vm259_vm0, %v46_v29 }
  0x1e   :  { %1855 = vmatprep.mubr.msk.f32.mxu0 %vm259_vm0, %v47_v30  ;;  %176 = vperm.xlu1 %2021, %v82_v31  }
  0x1f   :  { %171 = vperm.xlu0 %2020, %v81_v32  }
  0x21   :  { %1856 = vmatmul.mubr.msk.f32.gmra.mrb[12].mxu0 %vm259_vm0, %v48_v33 }
  0x22   :  { %1858 = vmatprep.mubr.msk.f32.mxu0 %vm259_vm0, %v49_v34  ;;  %186 = vperm.xlu1 %2021, %v84_v35  }
  0x23   :  { %181 = vperm.xlu0 %2020, %v83_v36  }
  0x25   :  { %1859 = vmatmul.mubr.msk.f32.gmra.mrb[14].mxu0 %vm259_vm0, %v50_v37 }
  0x26   :  { %1861 = vmatprep.mubr.msk.f32.mxu0 %vm259_vm0, %v51_v38  ;;  %196 = vperm.xlu1 %2021, %v86_v39  }
  0x27   :  { %191 = vperm.xlu0 %2020, %v85_v40  }
  0x28   :  { %14 = vsyncpa [#allocation3], 0  ;;  %v54_v45 = vld [vmem:[%s3271_s1 + $0x98] sm:$0xff]  ;;  %v55_v46 = vld [vmem:[%s3271_s1 + $0xa0] sm:$0xff]  ;;  %v2239_v28 = vmov 0.0|0.0   ;;  %s2240_s0 = smov [#allocation2]  }
  0x29   :  { %1862 = vmatmul.mubr.msk.f32.gmra.mrb[16].mxu0 %vm259_vm0, %v52_v41  ;;  %v90_v47 = vld [vmem:[%s3272_s2 + $0xb8] sm:$0xff]  ;;  %v89_v48 = vld [vmem:[%s3272_s2 + $0xb0] sm:$0xff]  ;;  %v56_v49 = vld [vmem:[%s3271_s1 + $0xa8] sm:$0xff]  ;;  %1889 = vmatprep.subr.bf16.mxu1 %v2239_v28  ;;  %s1724_s23 = sshll.u32 %s2240_s0, 4  ;;  %s1725_s23 = int_to_ptr.vmem [resolvable:$true] %s1724_s23 }
  0x2a   :  { %1864 = vmatprep.mubr.msk.f32.mxu0 %vm259_vm0, %v53_v42  ;;  %206 = vperm.xlu1 %2021, %v88_v43   ;;  %v57_v50 = vld [vmem:[%s3271_s1 + $0xb0] sm:$0xff]  ;;  %v92_v51 = vld [vmem:[%s3272_s2 + $0xc8] sm:$0xff]  ;;  %v91_v52 = vld [vmem:[%s3272_s2 + $0xc0] sm:$0xff]  ;;  %s2214_s24 = scalar_lea.vmem %s1725_s23, 128  ;;  %p2219_p1 = scmp.lt.s32.totalorder %s1725_s23, %s1725_s23 }
  0x2b   :  { %201 = vperm.xlu0 %2020, %v87_v44   ;;  %v58_v53 = vld [vmem:[%s3271_s1 + $0xb8] sm:$0xff]  ;;  %v59_v54 = vld [vmem:[%s3271_s1 + $0xc0] sm:$0xff]  ;;  %v93_v56 = vld [vmem:[%s3272_s2 + $0xd0] sm:$0xff]  ;;  %1937 = vmatprep.subr.bf16.mxu0 %v2239_v28  ;;  %p2215_p0 = scmp.ne.s32.totalorder %s1725_s23, %s2214_s24  ;;  %p2220_p2 = scmp.lt.s32.totalorder %s2214_s24, %s2214_s24 }
  0x2c   :  { %v94_v55 = vld [vmem:[%s3272_s2 + $0xd8] sm:$0xff]  ;;  %v60_v57 = vld [vmem:[%s3271_s1 + $0xc8] sm:$0xff]  ;;  %v61_v58 = vld [vmem:[%s3271_s1 + $0xd0] sm:$0xff] }
  0x2d   :  { %1865 = vmatmul.mubr.msk.f32.gmra.mrb[18].mxu0 %vm259_vm0, %v54_v45  ;;  %v96_v59 = vld [vmem:[%s3272_s2 + $0xe8] sm:$0xff]  ;;  %v95_v60 = vld [vmem:[%s3272_s2 + $0xe0] sm:$0xff]  ;;  %v62_v61 = vld [vmem:[%s3271_s1 + $0xd8] sm:$0xff]  ;;  %p2221_p3 = por %p2220_p2, %p2219_p1 }
  0x2e   :  { %1867 = vmatprep.mubr.msk.f32.mxu0 %vm259_vm0, %v55_v46  ;;  %216 = vperm.xlu1 %2021, %v90_v47   ;;  %v63_v62 = vld [vmem:[%s3271_s1 + $0xe0] sm:$0xff]  ;;  %v98_v63 = vld [vmem:[%s3272_s2 + $0xf8] sm:$0xff]  ;;  %v97_v0 = vld [vmem:[%s3272_s2 + $0xf0] sm:$0xff] }
  0x2f   :  { %211 = vperm.xlu0 %2020, %v89_v48   ;;  %v64_v1 = vld [vmem:[%s3271_s1 + $0xe8] sm:$0xff]  ;;  %v65_v2 = vld [vmem:[%s3271_s1 + $0xf0] sm:$0xff]  ;;  %v677_v4 = vld [vmem:[%s3274_s4] sm:$0xff]  ;;  %p2222_p4 = pnand %p2221_p3, %p2215_p0 }
  0x30   :  { %v678_v3 = vld [vmem:[%s3274_s4 + $0x8] sm:$0xff]  ;;  %v66_v5 = vld [vmem:[%s3271_s1 + $0xf8] sm:$0xff]  ;;  %v679_v7 = vld [vmem:[%s3274_s4 + $0x10] sm:$0xff] }
  0x31   :  { %1868 = vmatmul.mubr.msk.f32.gmra.mrb[20].mxu0 %vm259_vm0, %v56_v49  ;;  %v680_v6 = vld [vmem:[%s3274_s4 + $0x18] sm:$0xff]  ;;  %v682_v8 = vld [vmem:[%s3274_s4 + $0x28] sm:$0xff]  ;;  %v681_v9 = vld [vmem:[%s3274_s4 + $0x20] sm:$0xff] }
  0x32   :  { %1870 = vmatprep.mubr.msk.f32.mxu0 %vm259_vm0, %v57_v50  ;;  %226 = vperm.xlu1 %2021, %v92_v51   ;;  %v684_v10 = vld [vmem:[%s3274_s4 + $0x38] sm:$0xff]  ;;  %v683_v11 = vld [vmem:[%s3274_s4 + $0x30] sm:$0xff]  ;;  %v686_v12 = vld [vmem:[%s3274_s4 + $0x48] sm:$0xff] }
  0x33   :  { %221 = vperm.xlu0 %2020, %v91_v52   ;;  %v685_v13 = vld [vmem:[%s3274_s4 + $0x40] sm:$0xff]  ;;  %v688_v14 = vld [vmem:[%s3274_s4 + $0x58] sm:$0xff]  ;;  %v687_v15 = vld [vmem:[%s3274_s4 + $0x50] sm:$0xff] }
  0x34   :  { %v690_v16 = vld [vmem:[%s3274_s4 + $0x68] sm:$0xff]  ;;  %v689_v17 = vld [vmem:[%s3274_s4 + $0x60] sm:$0xff]  ;;  %v692_v18 = vld [vmem:[%s3274_s4 + $0x78] sm:$0xff] }
  0x35   :  { %1871 = vmatmul.mubr.msk.f32.gmra.mrb[22].mxu0 %vm259_vm0, %v58_v53  ;;  %v691_v19 = vld [vmem:[%s3274_s4 + $0x70] sm:$0xff]  ;;  %v694_v20 = vld [vmem:[%s3274_s4 + $0x88] sm:$0xff]  ;;  %v693_v21 = vld [vmem:[%s3274_s4 + $0x80] sm:$0xff] }
  0x36   :  { %1873 = vmatprep.mubr.msk.f32.mxu0 %vm259_vm0, %v59_v54  ;;  %236 = vperm.xlu1 %2021, %v94_v55   ;;  %v696_v22 = vld [vmem:[%s3274_s4 + $0x98] sm:$0xff]  ;;  %v695_v23 = vld [vmem:[%s3274_s4 + $0x90] sm:$0xff]  ;;  %v698_v24 = vld [vmem:[%s3274_s4 + $0xa8] sm:$0xff] }
  0x37   :  { %231 = vperm.xlu0 %2020, %v93_v56   ;;  %v697_v25 = vld [vmem:[%s3274_s4 + $0xa0] sm:$0xff]  ;;  %v700_v26 = vld [vmem:[%s3274_s4 + $0xb8] sm:$0xff]  ;;  %v699_v27 = vld [vmem:[%s3274_s4 + $0xb0] sm:$0xff] }
  0x38   :  { %v702_v29 = vld [vmem:[%s3274_s4 + $0xc8] sm:$0xff]  ;;  %v701_v30 = vld [vmem:[%s3274_s4 + $0xc0] sm:$0xff]  ;;  %v704_v31 = vld [vmem:[%s3274_s4 + $0xd8] sm:$0xff] }
  0x39   :  { %1874 = vmatmul.mubr.msk.f32.gmra.mrb[24].mxu0 %vm259_vm0, %v60_v57  ;;  %v703_v32 = vld [vmem:[%s3274_s4 + $0xd0] sm:$0xff]  ;;  %v706_v33 = vld [vmem:[%s3274_s4 + $0xe8] sm:$0xff]  ;;  %v705_v34 = vld [vmem:[%s3274_s4 + $0xe0] sm:$0xff] }
  0x3a   :  { %1876 = vmatprep.mubr.msk.f32.mxu0 %vm259_vm0, %v61_v58  ;;  %246 = vperm.xlu1 %2021, %v96_v59   ;;  %v708_v35 = vld [vmem:[%s3274_s4 + $0xf8] sm:$0xff]  ;;  %v707_v36 = vld [vmem:[%s3274_s4 + $0xf0] sm:$0xff]  ;;  %v1207_v37 = vld [vmem:[%s3276_s6 + $0x88] sm:$0xff] }
  0x3b   :  { %241 = vperm.xlu0 %2020, %v95_v60   ;;  %v1206_v38 = vld [vmem:[%s3276_s6 + $0x80] sm:$0xff]  ;;  %v1191_v39 = vld [vmem:[%s3276_s6 + $0x8] sm:$0xff]  ;;  %v1209_v41 = vld [vmem:[%s3276_s6 + $0x98] sm:$0xff] }
  0x3c   :  { %v1190_v40 = vld [vmem:[%s3276_s6] sm:$0xff]  ;;  %v1208_v42 = vld [vmem:[%s3276_s6 + $0x90] sm:$0xff]  ;;  %v1193_v43 = vld [vmem:[%s3276_s6 + $0x18] sm:$0xff] }
  0x3d   :  { %1877 = vmatmul.mubr.msk.f32.gmra.mrb[26].mxu0 %vm259_vm0, %v62_v61  ;;  %v1192_v44 = vld [vmem:[%s3276_s6 + $0x10] sm:$0xff]  ;;  %v1211_v45 = vld [vmem:[%s3276_s6 + $0xa8] sm:$0xff]  ;;  %v1210_v46 = vld [vmem:[%s3276_s6 + $0xa0] sm:$0xff] }
  0x3e   :  { %1879 = vmatprep.mubr.msk.f32.mxu0 %vm259_vm0, %v63_v62  ;;  %256 = vperm.xlu1 %2021, %v98_v63   ;;  %v1195_v47 = vld [vmem:[%s3276_s6 + $0x28] sm:$0xff]  ;;  %v1194_v48 = vld [vmem:[%s3276_s6 + $0x20] sm:$0xff]  ;;  %v1213_v49 = vld [vmem:[%s3276_s6 + $0xb8] sm:$0xff] }
  0x3f   :  { %251 = vperm.xlu0 %2020, %v97_v0   ;;  %v1212_v50 = vld [vmem:[%s3276_s6 + $0xb0] sm:$0xff]  ;;  %v1197_v51 = vld [vmem:[%s3276_s6 + $0x38] sm:$0xff]  ;;  %v1215_v53 = vld [vmem:[%s3276_s6 + $0xc8] sm:$0xff] }
  0x40   :  { %v1196_v52 = vld [vmem:[%s3276_s6 + $0x30] sm:$0xff]  ;;  %v1214_v54 = vld [vmem:[%s3276_s6 + $0xc0] sm:$0xff]  ;;  %v1199_v55 = vld [vmem:[%s3276_s6 + $0x48] sm:$0xff] }
  0x41   :  { %1880 = vmatmul.mubr.msk.f32.gmra.mrb[28].mxu0 %vm259_vm0, %v64_v1  ;;  %v1198_v56 = vld [vmem:[%s3276_s6 + $0x40] sm:$0xff]  ;;  %v1217_v57 = vld [vmem:[%s3276_s6 + $0xd8] sm:$0xff]  ;;  %v1216_v58 = vld [vmem:[%s3276_s6 + $0xd0] sm:$0xff] }
  0x42   :  { %1882 = vmatprep.mubr.msk.f32.mxu0 %vm259_vm0, %v65_v2  ;;  %716 = vperm.xlu1 %2021, %v678_v3   ;;  %v614_v59 = vld [vmem:[%s3273_s3 + $0x8] sm:$0xff]  ;;  %v1201_v60 = vld [vmem:[%s3276_s6 + $0x58] sm:$0xff]  ;;  %v1200_v61 = vld [vmem:[%s3276_s6 + $0x50] sm:$0xff] }
  0x43   :  { %711 = vperm.xlu0 %2020, %v677_v4   ;;  %933 = vmatprep.mubr.f32.mxu1 %v614_v59  ;;  %v1219_v62 = vld [vmem:[%s3276_s6 + $0xe8] sm:$0xff]  ;;  %v1218_v63 = vld [vmem:[%s3276_s6 + $0xe0] sm:$0xff]  ;;  %v1221_v2 = vld [vmem:[%s3276_s6 + $0xf8] sm:$0xff] }
  0x44   :  { %v1203_v0 = vld [vmem:[%s3276_s6 + $0x68] sm:$0xff]  ;;  %v1202_v1 = vld [vmem:[%s3276_s6 + $0x60] sm:$0xff]  ;;  %v1220_v3 = vld [vmem:[%s3276_s6 + $0xf0] sm:$0xff] }
  0x45   :  { %1883 = vmatmul.mubr.msk.f32.gmra.mrb[30].mxu0 %vm259_vm0, %v66_v5  ;;  %v1205_v4 = vld [vmem:[%s3276_s6 + $0x78] sm:$0xff]  ;;  %v1204_v5 = vld [vmem:[%s3276_s6 + $0x70] sm:$0xff] }
  0x46   :  { %726 = vperm.xlu1 %2021, %v680_v6  }
  0x47   :  { %721 = vperm.xlu0 %2020, %v679_v7  }
  0x4a   :  { %736 = vperm.xlu1 %2021, %v682_v8   ;;  %v1641_v8 = vld [vmem:[%s3278_s8] sm:$0xff] }
  0x4b   :  { %731 = vperm.xlu0 %2020, %v681_v9  }
  0x4e   :  { %746 = vperm.xlu1 %2021, %v684_v10  }
  0x4f   :  { %741 = vperm.xlu0 %2020, %v683_v11  }
  0x52   :  { %756 = vperm.xlu1 %2021, %v686_v12  }
  0x53   :  { %751 = vperm.xlu0 %2020, %v685_v13  }
  0x56   :  { %766 = vperm.xlu1 %2021, %v688_v14  }
  0x57   :  { %761 = vperm.xlu0 %2020, %v687_v15  }
  0x5a   :  { %776 = vperm.xlu1 %2021, %v690_v16  }
  0x5b   :  { %771 = vperm.xlu0 %2020, %v689_v17  }
  0x5e   :  { %786 = vperm.xlu1 %2021, %v692_v18  }
  0x5f   :  { %781 = vperm.xlu0 %2020, %v691_v19  }
  0x62   :  { %796 = vperm.xlu1 %2021, %v694_v20  }
  0x63   :  { %791 = vperm.xlu0 %2020, %v693_v21  }
  0x66   :  { %806 = vperm.xlu1 %2021, %v696_v22  }
  0x67   :  { %801 = vperm.xlu0 %2020, %v695_v23  }
  0x6a   :  { %816 = vperm.xlu1 %2021, %v698_v24  }
  0x6b   :  { %811 = vperm.xlu0 %2020, %v697_v25  }
  0x6e   :  { %826 = vperm.xlu1 %2021, %v700_v26  }
  0x6f   :  { %821 = vperm.xlu0 %2020, %v699_v27  }
  0x72   :  { %836 = vperm.xlu1 %2021, %v702_v29  }
  0x73   :  { %831 = vperm.xlu0 %2020, %v701_v30  }
  0x76   :  { %846 = vperm.xlu1 %2021, %v704_v31  }
  0x77   :  { %841 = vperm.xlu0 %2020, %v703_v32  }
  0x7a   :  { %856 = vperm.xlu1 %2021, %v706_v33  }
  0x7b   :  { %851 = vperm.xlu0 %2020, %v705_v34  }
  0x7e   :  { %866 = vperm.xlu1 %2021, %v708_v35  }
  0x7f   :  { %861 = vperm.xlu0 %2020, %v707_v36  }
  0x81   :  { %v112_v6 = vpop.permute.xlu1 %111  ;;  %v102_v7 = vpop.permute.xlu0 %101 }
  0x82   :  { %1309 = vperm.xlu1 %2021, %v1207_v37  }
  0x83   :  { %1304 = vperm.xlu0 %2020, %v1206_v38  }
  0x85   :  { %v117_v9 = vpop.permute.xlu1 %116 }
  0x86   :  { %1229 = vperm.xlu1 %2021, %v1191_v39   ;;  %v107_v10 = vpop.permute.xlu0 %106 }
  0x87   :  { %1224 = vperm.xlu0 %2020, %v1190_v40  }
  0x89   :  { %v127_v11 = vpop.permute.xlu1 %126 }
  0x8a   :  { %1319 = vperm.xlu1 %2021, %v1209_v41   ;;  %v122_v12 = vpop.permute.xlu0 %121 }
  0x8b   :  { %1314 = vperm.xlu0 %2020, %v1208_v42  }
  0x8d   :  { %v137_v13 = vpop.permute.xlu1 %136 }
  0x8e   :  { %1239 = vperm.xlu1 %2021, %v1193_v43   ;;  %v132_v14 = vpop.permute.xlu0 %131 }
  0x8f   :  { %1234 = vperm.xlu0 %2020, %v1192_v44  }
  0x91   :  { %v147_v15 = vpop.permute.xlu1 %146 }
  0x92   :  { %1329 = vperm.xlu1 %2021, %v1211_v45   ;;  %v142_v16 = vpop.permute.xlu0 %141 }
  0x93   :  { %1324 = vperm.xlu0 %2020, %v1210_v46  }
  0x95   :  { %v157_v17 = vpop.permute.xlu1 %156 }
  0x96   :  { %1249 = vperm.xlu1 %2021, %v1195_v47   ;;  %v152_v19 = vpop.permute.xlu0 %151 }
  0x97   :  { %1244 = vperm.xlu0 %2020, %v1194_v48  }
  0x99   :  { %v167_v26 = vpop.permute.xlu1 %166 }
  0x9a   :  { %1339 = vperm.xlu1 %2021, %v1213_v49   ;;  %v162_v29 = vpop.permute.xlu0 %161 }
  0x9b   :  { %1334 = vperm.xlu0 %2020, %v1212_v50  }
  0x9d   :  { %v177_v34 = vpop.permute.xlu1 %176 }
  0x9e   :  { %1259 = vperm.xlu1 %2021, %v1197_v51   ;;  %v172_v37 = vpop.permute.xlu0 %171 }
  0x9f   :  { %1254 = vperm.xlu0 %2020, %v1196_v52  }
  0xa1   :  { %v187_v48 = vpop.permute.xlu1 %186 }
  0xa2   :  { %1349 = vperm.xlu1 %2021, %v1215_v53   ;;  %v182_v50 = vpop.permute.xlu0 %181 }
  0xa3   :  { %1344 = vperm.xlu0 %2020, %v1214_v54  }
  0xa5   :  { %v197_v59 = vpop.permute.xlu1 %196 }
  0xa6   :  { %1269 = vperm.xlu1 %2021, %v1199_v55  }
  0xa7   :  { %1264 = vperm.xlu0 %2020, %v1198_v56  }
  0xaa   :  { %1359 = vperm.xlu1 %2021, %v1217_v57  }
  0xab   :  { %1354 = vperm.xlu0 %2020, %v1216_v58  }
  0xae   :  { %1279 = vperm.xlu1 %2021, %v1201_v60  }
  0xaf   :  { %1274 = vperm.xlu0 %2020, %v1200_v61  }
  0xb2   :  { %1369 = vperm.xlu1 %2021, %v1219_v62   ;;  %v192_v62 = vpop.permute.xlu0 %191 }
  0xb3   :  { %1364 = vperm.xlu0 %2020, %v1218_v63  }
  0xb6   :  { %1289 = vperm.xlu1 %2021, %v1203_v0  }
  0xb7   :  { %1284 = vperm.xlu0 %2020, %v1202_v1  }
  0xba   :  { %1379 = vperm.xlu1 %2021, %v1221_v2  }
  0xbb   :  { %1374 = vperm.xlu0 %2020, %v1220_v3  }
  0xbe   :  { %1299 = vperm.xlu1 %2021, %v1205_v4  }
  0xbf   :  { %1294 = vperm.xlu0 %2020, %v1204_v5  }
  0xc3   :  { %1644 = vperm.xlu0 %2020, %v1641_v8  }
  0xdc   :  { %v1839_v18 = vpop.f32.mrb[0].mxu0 }
  0xdd   :  { %v428_v20 = vadd.f32 %v1839_v18, %v107_v10  ;;  %v422_v21 = vpop.f32.mrb[1].mxu0 }
  0xde   :  { %v423_v22 = vadd.f32 %v422_v21, %v102_v7 }
  0xdf   :  { %2022 = vtanh.f32 %v428_v20 }
  0xe0   :  { %2024 = vtanh.f32 %v423_v22  ;;  %v1842_v23 = vpop.f32.mrb[2].mxu0 }
  0xe1   :  { %v438_v24 = vadd.f32 %v1842_v23, %v117_v9  ;;  %v432_v25 = vpop.f32.mrb[3].mxu0  ;;  %v207_v9 = vpop.permute.xlu1 %206 }
  0xe2   :  { %v433_v27 = vadd.f32 %v432_v25, %v112_v6 }
  0xe3   :  { %2026 = vtanh.f32 %v438_v24 }
  0xe4   :  { %2028 = vtanh.f32 %v433_v27  ;;  %v1845_v30 = vpop.f32.mrb[4].mxu0 }
  0xe5   :  { %v448_v31 = vadd.f32 %v1845_v30, %v127_v11  ;;  %v442_v32 = vpop.f32.mrb[5].mxu0  ;;  %v202_v11 = vpop.permute.xlu0 %201 }
  0xe6   :  { %v443_v33 = vadd.f32 %v442_v32, %v122_v12  ;;  %v217_v20 = vpop.permute.xlu1 %216 }
  0xe7   :  { %2030 = vtanh.f32 %v448_v31 }
  0xe8   :  { %2032 = vtanh.f32 %v443_v33  ;;  %v1848_v35 = vpop.f32.mrb[6].mxu0 }
  0xe9   :  { %v2023_v36 = vpop.eup %2022  ;;  %v458_v38 = vadd.f32 %v1848_v35, %v137_v13  ;;  %v452_v39 = vpop.f32.mrb[7].mxu0 }
  0xea   :  { %v2025_v40 = vpop.eup %2024  ;;  %v453_v41 = vadd.f32 %v452_v39, %v132_v14  ;;  %v212_v23 = vpop.permute.xlu0 %211 }
  0xeb   :  { %2034 = vtanh.f32 %v458_v38  ;;  %v1890_v42 = vpack.c.bf16 %v2023_v36, %v2025_v40  ;;  %v227_v35 = vpop.permute.xlu1 %226 }
  0xec   :  { %2036 = vtanh.f32 %v453_v41  ;;  %v1851_v43 = vpop.f32.mrb[8].mxu0 }
  0xed   :  { %v2027_v44 = vpop.eup %2026  ;;  %v468_v45 = vadd.f32 %v1851_v43, %v147_v15  ;;  %v462_v46 = vpop.f32.mrb[9].mxu0  ;;  %1891 = vmatpush1.bf16.msra.mxu1 %v1890_v42 }
  0xee   :  { %v2029_v47 = vpop.eup %2028  ;;  %v463_v49 = vadd.f32 %v462_v46, %v142_v16  ;;  %1892 = vmatprep.subr.bf16.mxu1 %v2239_v28 }
  0xef   :  { %2038 = vtanh.f32 %v468_v45  ;;  %v1893_v51 = vpack.c.bf16 %v2027_v44, %v2029_v47  ;;  %v237_v46 = vpop.permute.xlu1 %236 }
  0xf0   :  { %2040 = vtanh.f32 %v463_v49  ;;  %v1854_v52 = vpop.f32.mrb[10].mxu0 }
  0xf1   :  { %v2031_v53 = vpop.eup %2030  ;;  %v478_v54 = vadd.f32 %v1854_v52, %v157_v17  ;;  %v472_v55 = vpop.f32.mrb[11].mxu0  ;;  %1894 = vmatpush1.bf16.msra.mxu1 %v1893_v51 }
  0xf2   :  { %v2033_v56 = vpop.eup %2032  ;;  %v473_v57 = vadd.f32 %v472_v55, %v152_v19  ;;  %1895 = vmatprep.subr.bf16.mxu1 %v2239_v28 }
  0xf3   :  { %2042 = vtanh.f32 %v478_v54  ;;  %v1896_v58 = vpack.c.bf16 %v2031_v53, %v2033_v56 }
  0xf4   :  { %2044 = vtanh.f32 %v473_v57  ;;  %v1857_v60 = vpop.f32.mrb[12].mxu0 }
  0xf5   :  { %v2035_v61 = vpop.eup %2034  ;;  %v488_v63 = vadd.f32 %v1857_v60, %v167_v26  ;;  %v482_v0 = vpop.f32.mrb[13].mxu0  ;;  %1897 = vmatpush1.bf16.msra.mxu1 %v1896_v58 }
  0xf6   :  { %v2037_v1 = vpop.eup %2036  ;;  %v483_v2 = vadd.f32 %v482_v0, %v162_v29  ;;  %1898 = vmatprep.subr.bf16.mxu1 %v2239_v28  ;;  %v247_v60 = vpop.permute.xlu1 %246 }
  0xf7   :  { %2046 = vtanh.f32 %v488_v63  ;;  %v1899_v3 = vpack.c.bf16 %v2035_v61, %v2037_v1 }
  0xf8   :  { %2048 = vtanh.f32 %v483_v2  ;;  %v1860_v4 = vpop.f32.mrb[14].mxu0 }
  0xf9   :  { %v2039_v5 = vpop.eup %2038  ;;  %v498_v6 = vadd.f32 %v1860_v4, %v177_v34  ;;  %v492_v7 = vpop.f32.mrb[15].mxu0  ;;  %1900 = vmatpush1.bf16.msra.mxu1 %v1899_v3 }
  0xfa   :  { %v2041_v8 = vpop.eup %2040  ;;  %v493_v10 = vadd.f32 %v492_v7, %v172_v37  ;;  %1901 = vmatprep.subr.bf16.mxu1 %v2239_v28  ;;  %v222_v37 = vpop.permute.xlu0 %221 }
  0xfb   :  { %2050 = vtanh.f32 %v498_v6  ;;  %v1902_v12 = vpack.c.bf16 %v2039_v5, %v2041_v8  ;;  %v257_v7 = vpop.permute.xlu1 %256 }
  0xfc   :  { %2052 = vtanh.f32 %v493_v10  ;;  %v1863_v13 = vpop.f32.mrb[16].mxu0 }
  0xfd   :  { %v2043_v14 = vpop.eup %2042  ;;  %v508_v15 = vadd.f32 %v1863_v13, %v187_v48  ;;  %v502_v16 = vpop.f32.mrb[17].mxu0  ;;  %1903 = vmatpush1.bf16.msra.mxu1 %v1902_v12 }
  0xfe   :  { %v2045_v17 = vpop.eup %2044  ;;  %v503_v18 = vadd.f32 %v502_v16, %v182_v50  ;;  %1904 = vmatprep.subr.bf16.mxu1 %v2239_v28  ;;  %v232_v49 = vpop.permute.xlu0 %231 }
  0xff   :  { %2054 = vtanh.f32 %v508_v15  ;;  %v1905_v19 = vpack.c.bf16 %v2043_v14, %v2045_v17 }
 0x100   :  { %2056 = vtanh.f32 %v503_v18  ;;  %v1866_v21 = vpop.f32.mrb[18].mxu0 }
 0x101   :  { %v2047_v22 = vpop.eup %2046  ;;  %v518_v24 = vadd.f32 %v1866_v21, %v197_v59  ;;  %v512_v25 = vpop.f32.mrb[19].mxu0  ;;  %1906 = vmatpush1.bf16.msra.mxu1 %v1905_v19 }
 0x102   :  { %v2049_v26 = vpop.eup %2048  ;;  %v513_v27 = vadd.f32 %v512_v25, %v192_v62  ;;  %1907 = vmatprep.subr.bf16.mxu1 %v2239_v28  ;;  %v242_v62 = vpop.permute.xlu0 %241  ;;  %v613_v25 = vld [vmem:[%s3273_s3] sm:$0xff] }
 0x103   :  { %2058 = vtanh.f32 %v518_v24  ;;  %v1908_v29 = vpack.c.bf16 %v2047_v22, %v2049_v26  ;;  %v616_v26 = vld [vmem:[%s3273_s3 + $0x18] sm:$0xff] }
 0x104   :  { %2060 = vtanh.f32 %v513_v27  ;;  %v1869_v30 = vpop.f32.mrb[20].mxu0  ;;  %v615_v27 = vld [vmem:[%s3273_s3 + $0x10] sm:$0xff] }
 0x105   :  { %v2051_v31 = vpop.eup %2050  ;;  %v528_v32 = vadd.f32 %v1869_v30, %v207_v9  ;;  %v522_v33 = vpop.f32.mrb[21].mxu0  ;;  %1909 = vmatpush1.bf16.msra.mxu1 %v1908_v29  ;;  %v618_v29 = vld [vmem:[%s3273_s3 + $0x28] sm:$0xff]  ;;  %v617_v30 = vld [vmem:[%s3273_s3 + $0x20] sm:$0xff] }
 0x106   :  { %v2053_v34 = vpop.eup %2052  ;;  %v523_v36 = vadd.f32 %v522_v33, %v202_v11  ;;  %1910 = vmatprep.subr.bf16.mxu1 %v2239_v28  ;;  %v252_v10 = vpop.permute.xlu0 %251  ;;  %v622_v33 = vld [vmem:[%s3273_s3 + $0x48] sm:$0xff] }
 0x107   :  { %2062 = vtanh.f32 %v528_v32  ;;  %v1911_v38 = vpack.c.bf16 %v2051_v31, %v2053_v34  ;;  %v620_v31 = vld [vmem:[%s3273_s3 + $0x38] sm:$0xff]  ;;  %v619_v32 = vld [vmem:[%s3273_s3 + $0x30] sm:$0xff]  ;;  %v621_v34 = vld [vmem:[%s3273_s3 + $0x40] sm:$0xff] }
 0x108   :  { %2064 = vtanh.f32 %v523_v36  ;;  %v1872_v39 = vpop.f32.mrb[22].mxu0  ;;  %v623_v36 = vld [vmem:[%s3273_s3 + $0x50] sm:$0xff] }
 0x109   :  { %v2055_v40 = vpop.eup %2054  ;;  %v538_v41 = vadd.f32 %v1872_v39, %v217_v20  ;;  %v532_v42 = vpop.f32.mrb[23].mxu0  ;;  %1912 = vmatpush1.bf16.msra.mxu1 %v1911_v38  ;;  %v625_v38 = vld [vmem:[%s3273_s3 + $0x60] sm:$0xff]  ;;  %v628_v39 = vld [vmem:[%s3273_s3 + $0x78] sm:$0xff] }
 0x10a   :  { %v2057_v43 = vpop.eup %2056  ;;  %v533_v44 = vadd.f32 %v532_v42, %v212_v23  ;;  %1913 = vmatprep.subr.bf16.mxu1 %v2239_v28  ;;  %v629_v42 = vld [vmem:[%s3273_s3 + $0x80] sm:$0xff] }
 0x10b   :  { %2066 = vtanh.f32 %v538_v41  ;;  %v1914_v45 = vpack.c.bf16 %v2055_v40, %v2057_v43  ;;  %v627_v40 = vld [vmem:[%s3273_s3 + $0x70] sm:$0xff]  ;;  %v630_v41 = vld [vmem:[%s3273_s3 + $0x88] sm:$0xff]  ;;  %v632_v43 = vld [vmem:[%s3273_s3 + $0x98] sm:$0xff] }
 0x10c   :  { %2068 = vtanh.f32 %v533_v44  ;;  %v1875_v47 = vpop.f32.mrb[24].mxu0  ;;  %v631_v44 = vld [vmem:[%s3273_s3 + $0x90] sm:$0xff] }
 0x10d   :  { %v2059_v48 = vpop.eup %2058  ;;  %v548_v50 = vadd.f32 %v1875_v47, %v227_v35  ;;  %v542_v51 = vpop.f32.mrb[25].mxu0  ;;  %1915 = vmatpush1.bf16.msra.mxu1 %v1914_v45  ;;  %v624_v35 = vld [vmem:[%s3273_s3 + $0x58] sm:$0xff]  ;;  %v634_v45 = vld [vmem:[%s3273_s3 + $0xa8] sm:$0xff] }
 0x10e   :  { %v2061_v52 = vpop.eup %2060  ;;  %v543_v53 = vadd.f32 %v542_v51, %v222_v37  ;;  %1916 = vmatprep.subr.bf16.mxu1 %v2239_v28  ;;  %v626_v37 = vld [vmem:[%s3273_s3 + $0x68] sm:$0xff]  ;;  %v636_v47 = vld [vmem:[%s3273_s3 + $0xb8] sm:$0xff] }
 0x10f   :  { %2070 = vtanh.f32 %v548_v50  ;;  %v1917_v54 = vpack.c.bf16 %v2059_v48, %v2061_v52  ;;  %v635_v48 = vld [vmem:[%s3273_s3 + $0xb0] sm:$0xff]  ;;  %v637_v50 = vld [vmem:[%s3273_s3 + $0xc0] sm:$0xff]  ;;  %v640_v51 = vld [vmem:[%s3273_s3 + $0xd8] sm:$0xff] }
 0x110   :  { %2072 = vtanh.f32 %v543_v53  ;;  %v1878_v55 = vpop.f32.mrb[26].mxu0  ;;  %v639_v52 = vld [vmem:[%s3273_s3 + $0xd0] sm:$0xff]  ;;  %v642_v53 = vld [vmem:[%s3273_s3 + $0xe8] sm:$0xff] }
 0x111   :  { %v2063_v56 = vpop.eup %2062  ;;  %v558_v57 = vadd.f32 %v1878_v55, %v237_v46  ;;  %v552_v58 = vpop.f32.mrb[27].mxu0  ;;  %1918 = vmatpush1.bf16.msra.mxu1 %v1917_v54  ;;  %v633_v46 = vld [vmem:[%s3273_s3 + $0xa0] sm:$0xff]  ;;  %v644_v55 = vld [vmem:[%s3273_s3 + $0xf8] sm:$0xff] }
 0x112   :  { %v2065_v59 = vpop.eup %2064  ;;  %v553_v61 = vadd.f32 %v552_v58, %v232_v49  ;;  %1919 = vmatprep.subr.bf16.mxu1 %v2239_v28  ;;  %v638_v49 = vld [vmem:[%s3273_s3 + $0xc8] sm:$0xff]  ;;  %v641_v54 = vld [vmem:[%s3273_s3 + $0xe0] sm:$0xff] }
 0x113   :  { %2074 = vtanh.f32 %v558_v57  ;;  %v1920_v63 = vpack.c.bf16 %v2063_v56, %v2065_v59  ;;  %v643_v56 = vld [vmem:[%s3273_s3 + $0xf0] sm:$0xff]  ;;  %v646_v57 = vld [vmem:[%s3273_s3 + $0x108] sm:$0xff]  ;;  %v645_v58 = vld [vmem:[%s3273_s3 + $0x100] sm:$0xff] }
 0x114   :  { %2076 = vtanh.f32 %v553_v61  ;;  %v1881_v0 = vpop.f32.mrb[28].mxu0  ;;  %v648_v59 = vld [vmem:[%s3273_s3 + $0x118] sm:$0xff]  ;;  %v650_v61 = vld [vmem:[%s3273_s3 + $0x128] sm:$0xff] }
 0x115   :  { %v2067_v1 = vpop.eup %2066  ;;  %v568_v2 = vadd.f32 %v1881_v0, %v247_v60  ;;  %v562_v3 = vpop.f32.mrb[29].mxu0  ;;  %1921 = vmatpush1.bf16.msra.mxu1 %v1920_v63  ;;  %v647_v60 = vld [vmem:[%s3273_s3 + $0x110] sm:$0xff]  ;;  %v652_v63 = vld [vmem:[%s3273_s3 + $0x138] sm:$0xff] }
 0x116   :  { %v2069_v4 = vpop.eup %2068  ;;  %v563_v5 = vadd.f32 %v562_v3, %v242_v62  ;;  %1922 = vmatprep.subr.bf16.mxu1 %v2239_v28  ;;  %v649_v62 = vld [vmem:[%s3273_s3 + $0x120] sm:$0xff]  ;;  %v651_v0 = vld [vmem:[%s3273_s3 + $0x130] sm:$0xff]  ;;  %v656_v3 = vld [vmem:[%s3273_s3 + $0x158] sm:$0xff] }
 0x117   :  { %2078 = vtanh.f32 %v568_v2  ;;  %v1923_v6 = vpack.c.bf16 %v2067_v1, %v2069_v4  ;;  %v654_v1 = vld [vmem:[%s3273_s3 + $0x148] sm:$0xff]  ;;  %v653_v2 = vld [vmem:[%s3273_s3 + $0x140] sm:$0xff]  ;;  %v655_v4 = vld [vmem:[%s3273_s3 + $0x150] sm:$0xff] }
 0x118   :  { %2080 = vtanh.f32 %v563_v5  ;;  %v1884_v8 = vpop.f32.mrb[30].mxu0  ;;  %v658_v5 = vld [vmem:[%s3273_s3 + $0x168] sm:$0xff] }
 0x119   :  { %v2071_v9 = vpop.eup %2070  ;;  %v578_v11 = vadd.f32 %v1884_v8, %v257_v7  ;;  %v572_v12 = vpop.f32.mrb[31].mxu0  ;;  %1924 = vmatpush1.bf16.msra.mxu1 %v1923_v6  ;;  %v657_v6 = vld [vmem:[%s3273_s3 + $0x160] sm:$0xff]  ;;  %v660_v7 = vld [vmem:[%s3273_s3 + $0x178] sm:$0xff]  ;;  %v659_v8 = vld [vmem:[%s3273_s3 + $0x170] sm:$0xff] }
 0x11a   :  { %v2073_v13 = vpop.eup %2072  ;;  %v573_v14 = vadd.f32 %v572_v12, %v252_v10  ;;  %1925 = vmatprep.subr.bf16.mxu1 %v2239_v28  ;;  %v661_v10 = vld [vmem:[%s3273_s3 + $0x180] sm:$0xff]  ;;  %v663_v12 = vld [vmem:[%s3273_s3 + $0x190] sm:$0xff] }
 0x11b   :  { %2082 = vtanh.f32 %v578_v11  ;;  %v1926_v15 = vpack.c.bf16 %v2071_v9, %v2073_v13  ;;  %v662_v9 = vld [vmem:[%s3273_s3 + $0x188] sm:$0xff]  ;;  %v664_v11 = vld [vmem:[%s3273_s3 + $0x198] sm:$0xff] }
 0x11c   :  { %2084 = vtanh.f32 %v573_v14  ;;  %v666_v13 = vld [vmem:[%s3273_s3 + $0x1a8] sm:$0xff]  ;;  %v665_v14 = vld [vmem:[%s3273_s3 + $0x1a0] sm:$0xff] }
 0x11d   :  { %v2075_v16 = vpop.eup %2074  ;;  %1927 = vmatpush1.bf16.msra.mxu1 %v1926_v15  ;;  %v668_v15 = vld [vmem:[%s3273_s3 + $0x1b8] sm:$0xff] }
 0x11e   :  { %v2077_v17 = vpop.eup %2076  ;;  %1928 = vmatprep.subr.bf16.mxu1 %v2239_v28 }
 0x11f   :  { %v1929_v18 = vpack.c.bf16 %v2075_v16, %v2077_v17  ;;  %v667_v16 = vld [vmem:[%s3273_s3 + $0x1b0] sm:$0xff]  ;;  %v670_v17 = vld [vmem:[%s3273_s3 + $0x1c8] sm:$0xff] }
 0x121   :  { %v2079_v19 = vpop.eup %2078  ;;  %1930 = vmatpush1.bf16.msra.mxu1 %v1929_v18  ;;  %v669_v18 = vld [vmem:[%s3273_s3 + $0x1c0] sm:$0xff] }
 0x122   :  { %v2081_v20 = vpop.eup %2080  ;;  %1931 = vmatprep.subr.bf16.mxu1 %v2239_v28 }
 0x123   :  { %v1932_v21 = vpack.c.bf16 %v2079_v19, %v2081_v20  ;;  %v672_v19 = vld [vmem:[%s3273_s3 + $0x1d8] sm:$0xff]  ;;  %v671_v20 = vld [vmem:[%s3273_s3 + $0x1d0] sm:$0xff] }
 0x125   :  { %v2083_v22 = vpop.eup %2082  ;;  %1933 = vmatpush1.bf16.msra.mxu1 %v1932_v21  ;;  %v674_v21 = vld [vmem:[%s3273_s3 + $0x1e8] sm:$0xff] }
 0x126   :  { %v2085_v23 = vpop.eup %2084  ;;  %1934 = vmatprep.subr.bf16.mxu1 %v2239_v28 }
 0x127   :  { %v1935_v24 = vpack.c.bf16 %v2083_v22, %v2085_v23  ;;  %v673_v22 = vld [vmem:[%s3273_s3 + $0x1e0] sm:$0xff]  ;;  %v676_v23 = vld [vmem:[%s3273_s3 + $0x1f8] sm:$0xff] }
 0x129   :  { %1936 = vmatpush1.bf16.msra.mxu1 %v1935_v24  ;;  %v675_v24 = vld [vmem:[%s3273_s3 + $0x1f0] sm:$0xff] }
 0x12c   :  { %934 = vmatmul.mubr.f32.vlgmr.msra.gmra.mrb[0].mxu1 %v613_v25 }
 0x12d   :  { %938 = vmatprep.mubr.f32.mxu1 %v616_v26  ;;  %v712_v26 = vpop.permute.xlu0 %711 }
 0x130   :  { %939 = vmatmul.mubr.f32.gmra.mrb[2].mxu1 %v615_v27 }
 0x131   :  { %943 = vmatprep.mubr.f32.mxu1 %v618_v29 }
 0x134   :  { %944 = vmatmul.mubr.f32.gmra.mrb[4].mxu1 %v617_v30  ;;  %v717_v30 = vpop.permute.xlu1 %716 }
 0x135   :  { %948 = vmatprep.mubr.f32.mxu1 %v620_v31 }
 0x138   :  { %949 = vmatmul.mubr.f32.gmra.mrb[6].mxu1 %v619_v32 }
 0x139   :  { %953 = vmatprep.mubr.f32.mxu1 %v622_v33 }
 0x13c   :  { %954 = vmatmul.mubr.f32.gmra.mrb[8].mxu1 %v621_v34 }
 0x13d   :  { %958 = vmatprep.mubr.f32.mxu1 %v624_v35  ;;  %v722_v35 = vpop.permute.xlu0 %721 }
 0x140   :  { %959 = vmatmul.mubr.f32.gmra.mrb[10].mxu1 %v623_v36 }
 0x141   :  { %963 = vmatprep.mubr.f32.mxu1 %v626_v37 }
 0x144   :  { %964 = vmatmul.mubr.f32.gmra.mrb[12].mxu1 %v625_v38  ;;  %v727_v38 = vpop.permute.xlu1 %726 }
 0x145   :  { %968 = vmatprep.mubr.f32.mxu1 %v628_v39 }
 0x148   :  { %969 = vmatmul.mubr.f32.gmra.mrb[14].mxu1 %v627_v40  ;;  %v1127_v40 = vld [vmem:[%s3275_s5 + $0x8] sm:$0xff] }
 0x149   :  { %973 = vmatprep.mubr.f32.mxu1 %v630_v41  ;;  %1446 = vmatprep.mubr.f32.mxu0 %v1127_v40 }
 0x14c   :  { %974 = vmatmul.mubr.f32.gmra.mrb[16].mxu1 %v629_v42 }
 0x14d   :  { %978 = vmatprep.mubr.f32.mxu1 %v632_v43 }
 0x150   :  { %979 = vmatmul.mubr.f32.gmra.mrb[18].mxu1 %v631_v44 }
 0x151   :  { %983 = vmatprep.mubr.f32.mxu1 %v634_v45 }
 0x154   :  { %984 = vmatmul.mubr.f32.gmra.mrb[20].mxu1 %v633_v46  ;;  %v732_v46 = vpop.permute.xlu0 %731 }
 0x155   :  { %988 = vmatprep.mubr.f32.mxu1 %v636_v47 }
 0x158   :  { %989 = vmatmul.mubr.f32.gmra.mrb[22].mxu1 %v635_v48 }
 0x159   :  { %993 = vmatprep.mubr.f32.mxu1 %v638_v49 }
 0x15c   :  { %994 = vmatmul.mubr.f32.gmra.mrb[24].mxu1 %v637_v50  ;;  %v737_v50 = vpop.permute.xlu1 %736 }
 0x15d   :  { %998 = vmatprep.mubr.f32.mxu1 %v640_v51 }
 0x160   :  { %999 = vmatmul.mubr.f32.gmra.mrb[26].mxu1 %v639_v52 }
 0x161   :  { %1003 = vmatprep.mubr.f32.mxu1 %v642_v53 }
 0x164   :  { %1004 = vmatmul.mubr.f32.gmra.mrb[28].mxu1 %v641_v54 }
 0x165   :  { %1008 = vmatprep.mubr.f32.mxu1 %v644_v55 }
 0x168   :  { %1009 = vmatmul.mubr.f32.gmra.mrb[30].mxu1 %v643_v56 }
 0x169   :  { %1013 = vmatprep.mubr.f32.mxu1 %v646_v57  ;;  %v742_v57 = vpop.permute.xlu0 %741 }
 0x16c   :  { %1014 = vmatmul.mubr.f32.gmra.mrb[32].mxu1 %v645_v58 }
 0x16d   :  { %1018 = vmatprep.mubr.f32.mxu1 %v648_v59 }
 0x170   :  { %1019 = vmatmul.mubr.f32.gmra.mrb[34].mxu1 %v647_v60 }
 0x171   :  { %1023 = vmatprep.mubr.f32.mxu1 %v650_v61  ;;  %v747_v61 = vpop.permute.xlu1 %746 }
 0x174   :  { %1024 = vmatmul.mubr.f32.gmra.mrb[36].mxu1 %v649_v62 }
 0x175   :  { %1028 = vmatprep.mubr.f32.mxu1 %v652_v63 }
 0x178   :  { %1029 = vmatmul.mubr.f32.gmra.mrb[38].mxu1 %v651_v0 }
 0x179   :  { %1033 = vmatprep.mubr.f32.mxu1 %v654_v1 }
 0x17c   :  { %1034 = vmatmul.mubr.f32.gmra.mrb[40].mxu1 %v653_v2 }
 0x17d   :  { %1038 = vmatprep.mubr.f32.mxu1 %v656_v3 }
 0x180   :  { %1039 = vmatmul.mubr.f32.gmra.mrb[42].mxu1 %v655_v4  ;;  %v752_v4 = vpop.permute.xlu0 %751 }
 0x181   :  { %1043 = vmatprep.mubr.f32.mxu1 %v658_v5 }
 0x184   :  { %1044 = vmatmul.mubr.f32.gmra.mrb[44].mxu1 %v657_v6 }
 0x185   :  { %1048 = vmatprep.mubr.f32.mxu1 %v660_v7 }
 0x188   :  { %1049 = vmatmul.mubr.f32.gmra.mrb[46].mxu1 %v659_v8  ;;  %v757_v8 = vpop.permute.xlu1 %756 }
 0x189   :  { %1053 = vmatprep.mubr.f32.mxu1 %v662_v9 }
 0x18c   :  { %1054 = vmatmul.mubr.f32.gmra.mrb[48].mxu1 %v661_v10 }
 0x18d   :  { %1058 = vmatprep.mubr.f32.mxu1 %v664_v11 }
 0x190   :  { %1059 = vmatmul.mubr.f32.gmra.mrb[50].mxu1 %v663_v12 }
 0x191   :  { %1063 = vmatprep.mubr.f32.mxu1 %v666_v13 }
 0x194   :  { %1064 = vmatmul.mubr.f32.gmra.mrb[52].mxu1 %v665_v14 }
 0x195   :  { %1068 = vmatprep.mubr.f32.mxu1 %v668_v15  ;;  %v762_v15 = vpop.permute.xlu0 %761 }
 0x198   :  { %1069 = vmatmul.mubr.f32.gmra.mrb[54].mxu1 %v667_v16 }
 0x199   :  { %1073 = vmatprep.mubr.f32.mxu1 %v670_v17 }
 0x19c   :  { %1074 = vmatmul.mubr.f32.gmra.mrb[56].mxu1 %v669_v18 }
 0x19d   :  { %1078 = vmatprep.mubr.f32.mxu1 %v672_v19  ;;  %v767_v19 = vpop.permute.xlu1 %766 }
 0x1a0   :  { %1079 = vmatmul.mubr.f32.gmra.mrb[58].mxu1 %v671_v20 }
 0x1a1   :  { %1083 = vmatprep.mubr.f32.mxu1 %v674_v21 }
 0x1a4   :  { %1084 = vmatmul.mubr.f32.gmra.mrb[60].mxu1 %v673_v22 }
 0x1a5   :  { %1088 = vmatprep.mubr.f32.mxu1 %v676_v23 }
 0x1a8   :  { %1089 = vmatmul.mubr.f32.gmra.mrb[62].mxu1 %v675_v24 }
 0x1ff   :  { %v935_v25 = vpop.f32.mrb[0].mxu1 }
 0x200   :  { %v937_v27 = vpop.f32.mrb[1].mxu1  ;;  %v936_v29 = vadd.f32 %v935_v25, %v712_v26  ;;  %v772_v26 = vpop.permute.xlu0 %771 }
 0x202   :  { %2086 = vtanh.f32 %v936_v29 }
 0x203   :  { %v940_v31 = vpop.f32.mrb[2].mxu1 }
 0x204   :  { %v941_v32 = vadd.f32 %v940_v31, %v717_v30  ;;  %v942_v33 = vpop.f32.mrb[3].mxu1  ;;  %v777_v31 = vpop.permute.xlu1 %776 }
 0x206   :  { %2088 = vtanh.f32 %v941_v32 }
 0x207   :  { %v945_v34 = vpop.f32.mrb[4].mxu1 }
 0x208   :  { %v947_v36 = vpop.f32.mrb[5].mxu1  ;;  %v946_v37 = vadd.f32 %v945_v34, %v722_v35 }
 0x20a   :  { %2090 = vtanh.f32 %v946_v37 }
 0x20b   :  { %v950_v39 = vpop.f32.mrb[6].mxu1 }
 0x20c   :  { %v951_v41 = vadd.f32 %v950_v39, %v727_v38  ;;  %v952_v42 = vpop.f32.mrb[7].mxu1  ;;  %v2087_v43 = vpop.eup %2086 }
 0x20d   :  { %v782_v38 = vpop.permute.xlu0 %781  ;;  %v787_v42 = vpop.permute.xlu1 %786 }
 0x20e   :  { %2092 = vtanh.f32 %v951_v41 }
 0x20f   :  { %v955_v44 = vpop.f32.mrb[8].mxu1 }
 0x210   :  { %v2089_v45 = vpop.eup %2088  ;;  %v957_v47 = vpop.f32.mrb[9].mxu1  ;;  %v956_v48 = vadd.f32 %v955_v44, %v732_v46 }
 0x211   :  { %v1938_v49 = vpack.c.bf16 %v2089_v45, %v2087_v43 }
 0x212   :  { %2094 = vtanh.f32 %v956_v48 }
 0x213   :  { %v960_v51 = vpop.f32.mrb[10].mxu1  ;;  %1939 = vmatpush1.bf16.msra.mxu0 %v1938_v49  ;;  %v792_v49 = vpop.permute.xlu0 %791 }
 0x214   :  { %v961_v52 = vadd.f32 %v960_v51, %v737_v50  ;;  %v962_v53 = vpop.f32.mrb[11].mxu1  ;;  %1940 = vmatprep.subr.bf16.mxu0 %v2239_v28  ;;  %v2091_v54 = vpop.eup %2090 }
 0x215   :  { %v797_v53 = vpop.permute.xlu1 %796 }
 0x216   :  { %2096 = vtanh.f32 %v961_v52 }
 0x217   :  { %v965_v55 = vpop.f32.mrb[12].mxu1 }
 0x218   :  { %v2093_v56 = vpop.eup %2092  ;;  %v967_v58 = vpop.f32.mrb[13].mxu1  ;;  %v966_v59 = vadd.f32 %v965_v55, %v742_v57 }
 0x219   :  { %v1941_v60 = vpack.c.bf16 %v2093_v56, %v2091_v54 }
 0x21a   :  { %2098 = vtanh.f32 %v966_v59 }
 0x21b   :  { %v970_v62 = vpop.f32.mrb[14].mxu1  ;;  %1942 = vmatpush1.bf16.msra.mxu0 %v1941_v60  ;;  %v802_v60 = vpop.permute.xlu0 %801 }
 0x21c   :  { %v971_v63 = vadd.f32 %v970_v62, %v747_v61  ;;  %v972_v0 = vpop.f32.mrb[15].mxu1  ;;  %1943 = vmatprep.subr.bf16.mxu0 %v2239_v28  ;;  %v2095_v1 = vpop.eup %2094 }
 0x21d   :  { %v807_v0 = vpop.permute.xlu1 %806 }
 0x21e   :  { %2100 = vtanh.f32 %v971_v63 }
 0x21f   :  { %v975_v2 = vpop.f32.mrb[16].mxu1 }
 0x220   :  { %v2097_v3 = vpop.eup %2096  ;;  %v977_v5 = vpop.f32.mrb[17].mxu1  ;;  %v976_v6 = vadd.f32 %v975_v2, %v752_v4 }
 0x221   :  { %v1944_v7 = vpack.c.bf16 %v2097_v3, %v2095_v1 }
 0x222   :  { %2102 = vtanh.f32 %v976_v6 }
 0x223   :  { %v980_v9 = vpop.f32.mrb[18].mxu1  ;;  %1945 = vmatpush1.bf16.msra.mxu0 %v1944_v7  ;;  %v812_v7 = vpop.permute.xlu0 %811 }
 0x224   :  { %v981_v10 = vadd.f32 %v980_v9, %v757_v8  ;;  %v982_v11 = vpop.f32.mrb[19].mxu1  ;;  %1946 = vmatprep.subr.bf16.mxu0 %v2239_v28  ;;  %v2099_v12 = vpop.eup %2098 }
 0x225   :  { %v817_v11 = vpop.permute.xlu1 %816 }
 0x226   :  { %2104 = vtanh.f32 %v981_v10 }
 0x227   :  { %v985_v13 = vpop.f32.mrb[20].mxu1 }
 0x228   :  { %v2101_v14 = vpop.eup %2100  ;;  %v987_v16 = vpop.f32.mrb[21].mxu1  ;;  %v986_v17 = vadd.f32 %v985_v13, %v762_v15 }
 0x229   :  { %v1947_v18 = vpack.c.bf16 %v2101_v14, %v2099_v12 }
 0x22a   :  { %2106 = vtanh.f32 %v986_v17 }
 0x22b   :  { %v990_v20 = vpop.f32.mrb[22].mxu1  ;;  %1948 = vmatpush1.bf16.msra.mxu0 %v1947_v18  ;;  %v822_v18 = vpop.permute.xlu0 %821 }
 0x22c   :  { %v991_v21 = vadd.f32 %v990_v20, %v767_v19  ;;  %v992_v22 = vpop.f32.mrb[23].mxu1  ;;  %1949 = vmatprep.subr.bf16.mxu0 %v2239_v28  ;;  %v2103_v23 = vpop.eup %2102 }
 0x22d   :  { %v827_v22 = vpop.permute.xlu1 %826 }
 0x22e   :  { %2108 = vtanh.f32 %v991_v21 }
 0x22f   :  { %v995_v24 = vpop.f32.mrb[24].mxu1 }
 0x230   :  { %v2105_v25 = vpop.eup %2104  ;;  %v997_v27 = vpop.f32.mrb[25].mxu1  ;;  %v996_v29 = vadd.f32 %v995_v24, %v772_v26 }
 0x231   :  { %v1950_v30 = vpack.c.bf16 %v2105_v25, %v2103_v23 }
 0x232   :  { %2110 = vtanh.f32 %v996_v29 }
 0x233   :  { %v1000_v32 = vpop.f32.mrb[26].mxu1  ;;  %1951 = vmatpush1.bf16.msra.mxu0 %v1950_v30  ;;  %v832_v30 = vpop.permute.xlu0 %831 }
 0x234   :  { %v1001_v33 = vadd.f32 %v1000_v32, %v777_v31  ;;  %v1002_v34 = vpop.f32.mrb[27].mxu1  ;;  %1952 = vmatprep.subr.bf16.mxu0 %v2239_v28  ;;  %v2107_v35 = vpop.eup %2106 }
 0x235   :  { %v837_v34 = vpop.permute.xlu1 %836 }
 0x236   :  { %2112 = vtanh.f32 %v1001_v33 }
 0x237   :  { %v1005_v36 = vpop.f32.mrb[28].mxu1 }
 0x238   :  { %v2109_v37 = vpop.eup %2108  ;;  %v1007_v39 = vpop.f32.mrb[29].mxu1  ;;  %v1006_v40 = vadd.f32 %v1005_v36, %v782_v38 }
 0x239   :  { %v1953_v41 = vpack.c.bf16 %v2109_v37, %v2107_v35 }
 0x23a   :  { %2114 = vtanh.f32 %v1006_v40 }
 0x23b   :  { %v1010_v43 = vpop.f32.mrb[30].mxu1  ;;  %1954 = vmatpush1.bf16.msra.mxu0 %v1953_v41  ;;  %v842_v41 = vpop.permute.xlu0 %841 }
 0x23c   :  { %v1011_v44 = vadd.f32 %v1010_v43, %v787_v42  ;;  %v1012_v45 = vpop.f32.mrb[31].mxu1  ;;  %1955 = vmatprep.subr.bf16.mxu0 %v2239_v28  ;;  %v2111_v46 = vpop.eup %2110 }
 0x23d   :  { %v847_v45 = vpop.permute.xlu1 %846 }
 0x23e   :  { %2116 = vtanh.f32 %v1011_v44 }
 0x23f   :  { %v1015_v47 = vpop.f32.mrb[32].mxu1 }
 0x240   :  { %v2113_v48 = vpop.eup %2112  ;;  %v1017_v50 = vpop.f32.mrb[33].mxu1  ;;  %v1016_v51 = vadd.f32 %v1015_v47, %v792_v49 }
 0x241   :  { %v1956_v52 = vpack.c.bf16 %v2113_v48, %v2111_v46 }
 0x242   :  { %2118 = vtanh.f32 %v1016_v51 }
 0x243   :  { %v1020_v54 = vpop.f32.mrb[34].mxu1  ;;  %1957 = vmatpush1.bf16.msra.mxu0 %v1956_v52  ;;  %v852_v52 = vpop.permute.xlu0 %851 }
 0x244   :  { %v1021_v55 = vadd.f32 %v1020_v54, %v797_v53  ;;  %v1022_v56 = vpop.f32.mrb[35].mxu1  ;;  %1958 = vmatprep.subr.bf16.mxu0 %v2239_v28  ;;  %v2115_v57 = vpop.eup %2114 }
 0x245   :  { %v857_v56 = vpop.permute.xlu1 %856 }
 0x246   :  { %2120 = vtanh.f32 %v1021_v55 }
 0x247   :  { %v1025_v58 = vpop.f32.mrb[36].mxu1 }
 0x248   :  { %v2117_v59 = vpop.eup %2116  ;;  %v1027_v61 = vpop.f32.mrb[37].mxu1  ;;  %v1026_v62 = vadd.f32 %v1025_v58, %v802_v60 }
 0x249   :  { %v1959_v63 = vpack.c.bf16 %v2117_v59, %v2115_v57 }
 0x24a   :  { %2122 = vtanh.f32 %v1026_v62 }
 0x24b   :  { %v1030_v1 = vpop.f32.mrb[38].mxu1  ;;  %1960 = vmatpush1.bf16.msra.mxu0 %v1959_v63  ;;  %v862_v63 = vpop.permute.xlu0 %861 }
 0x24c   :  { %v1031_v2 = vadd.f32 %v1030_v1, %v807_v0  ;;  %v1032_v3 = vpop.f32.mrb[39].mxu1  ;;  %1961 = vmatprep.subr.bf16.mxu0 %v2239_v28  ;;  %v2119_v4 = vpop.eup %2118 }
 0x24d   :  { %v867_v3 = vpop.permute.xlu1 %866 }
 0x24e   :  { %2124 = vtanh.f32 %v1031_v2 }
 0x24f   :  { %v1035_v5 = vpop.f32.mrb[40].mxu1 }
 0x250   :  { %v2121_v6 = vpop.eup %2120  ;;  %v1037_v8 = vpop.f32.mrb[41].mxu1  ;;  %v1036_v9 = vadd.f32 %v1035_v5, %v812_v7 }
 0x251   :  { %v1962_v10 = vpack.c.bf16 %v2121_v6, %v2119_v4 }
 0x252   :  { %2126 = vtanh.f32 %v1036_v9 }
 0x253   :  { %v1040_v12 = vpop.f32.mrb[42].mxu1  ;;  %1963 = vmatpush1.bf16.msra.mxu0 %v1962_v10 }
 0x254   :  { %v1041_v13 = vadd.f32 %v1040_v12, %v817_v11  ;;  %v1042_v14 = vpop.f32.mrb[43].mxu1  ;;  %1964 = vmatprep.subr.bf16.mxu0 %v2239_v28  ;;  %v2123_v15 = vpop.eup %2122 }
 0x255   :  { %v1129_v14 = vld [vmem:[%s3275_s5 + $0x18] sm:$0xff] }
 0x256   :  { %2128 = vtanh.f32 %v1041_v13  ;;  %v1126_v13 = vld [vmem:[%s3275_s5] sm:$0xff] }
 0x257   :  { %v1045_v16 = vpop.f32.mrb[44].mxu1 }
 0x258   :  { %v2125_v17 = vpop.eup %2124  ;;  %v1047_v19 = vpop.f32.mrb[45].mxu1  ;;  %v1046_v20 = vadd.f32 %v1045_v16, %v822_v18  ;;  %v1130_v16 = vld [vmem:[%s3275_s5 + $0x20] sm:$0xff]  ;;  %v1132_v18 = vld [vmem:[%s3275_s5 + $0x30] sm:$0xff] }
 0x259   :  { %v1965_v21 = vpack.c.bf16 %v2125_v17, %v2123_v15  ;;  %v1128_v15 = vld [vmem:[%s3275_s5 + $0x10] sm:$0xff]  ;;  %v1133_v17 = vld [vmem:[%s3275_s5 + $0x38] sm:$0xff]  ;;  %v1135_v19 = vld [vmem:[%s3275_s5 + $0x48] sm:$0xff] }
 0x25a   :  { %2130 = vtanh.f32 %v1046_v20  ;;  %v1134_v20 = vld [vmem:[%s3275_s5 + $0x40] sm:$0xff] }
 0x25b   :  { %v1050_v23 = vpop.f32.mrb[46].mxu1  ;;  %1966 = vmatpush1.bf16.msra.mxu0 %v1965_v21  ;;  %v1137_v21 = vld [vmem:[%s3275_s5 + $0x58] sm:$0xff] }
 0x25c   :  { %v1051_v24 = vadd.f32 %v1050_v23, %v827_v22  ;;  %v1052_v25 = vpop.f32.mrb[47].mxu1  ;;  %1967 = vmatprep.subr.bf16.mxu0 %v2239_v28  ;;  %v2127_v26 = vpop.eup %2126  ;;  %v1136_v22 = vld [vmem:[%s3275_s5 + $0x50] sm:$0xff]  ;;  %v1139_v23 = vld [vmem:[%s3275_s5 + $0x68] sm:$0xff] }
 0x25d   :  { %v1141_v25 = vld [vmem:[%s3275_s5 + $0x78] sm:$0xff] }
 0x25e   :  { %2132 = vtanh.f32 %v1051_v24  ;;  %v1138_v24 = vld [vmem:[%s3275_s5 + $0x60] sm:$0xff] }
 0x25f   :  { %v1055_v27 = vpop.f32.mrb[48].mxu1 }
 0x260   :  { %v2129_v29 = vpop.eup %2128  ;;  %v1057_v31 = vpop.f32.mrb[49].mxu1  ;;  %v1056_v32 = vadd.f32 %v1055_v27, %v832_v30  ;;  %v1143_v27 = vld [vmem:[%s3275_s5 + $0x88] sm:$0xff]  ;;  %v1145_v30 = vld [vmem:[%s3275_s5 + $0x98] sm:$0xff] }
 0x261   :  { %v1968_v33 = vpack.c.bf16 %v2129_v29, %v2127_v26  ;;  %v1140_v26 = vld [vmem:[%s3275_s5 + $0x70] sm:$0xff]  ;;  %v1142_v29 = vld [vmem:[%s3275_s5 + $0x80] sm:$0xff] }
 0x262   :  { %2134 = vtanh.f32 %v1056_v32  ;;  %v1144_v31 = vld [vmem:[%s3275_s5 + $0x90] sm:$0xff]  ;;  %v1147_v32 = vld [vmem:[%s3275_s5 + $0xa8] sm:$0xff] }
 0x263   :  { %v1060_v35 = vpop.f32.mrb[50].mxu1  ;;  %1969 = vmatpush1.bf16.msra.mxu0 %v1968_v33  ;;  %v1146_v33 = vld [vmem:[%s3275_s5 + $0xa0] sm:$0xff] }
 0x264   :  { %v1061_v36 = vadd.f32 %v1060_v35, %v837_v34  ;;  %v1062_v37 = vpop.f32.mrb[51].mxu1  ;;  %1970 = vmatprep.subr.bf16.mxu0 %v2239_v28  ;;  %v2131_v38 = vpop.eup %2130  ;;  %v1149_v34 = vld [vmem:[%s3275_s5 + $0xb8] sm:$0xff]  ;;  %v1148_v35 = vld [vmem:[%s3275_s5 + $0xb0] sm:$0xff] }
 0x265   :  { %v1150_v37 = vld [vmem:[%s3275_s5 + $0xc0] sm:$0xff] }
 0x266   :  { %2136 = vtanh.f32 %v1061_v36  ;;  %v1151_v36 = vld [vmem:[%s3275_s5 + $0xc8] sm:$0xff] }
 0x267   :  { %v1065_v39 = vpop.f32.mrb[52].mxu1 }
 0x268   :  { %v2133_v40 = vpop.eup %2132  ;;  %v1067_v42 = vpop.f32.mrb[53].mxu1  ;;  %v1066_v43 = vadd.f32 %v1065_v39, %v842_v41  ;;  %v1152_v39 = vld [vmem:[%s3275_s5 + $0xd0] sm:$0xff]  ;;  %v1154_v41 = vld [vmem:[%s3275_s5 + $0xe0] sm:$0xff] }
 0x269   :  { %v1971_v44 = vpack.c.bf16 %v2133_v40, %v2131_v38  ;;  %v1153_v38 = vld [vmem:[%s3275_s5 + $0xd8] sm:$0xff]  ;;  %v1155_v40 = vld [vmem:[%s3275_s5 + $0xe8] sm:$0xff] }
 0x26a   :  { %2138 = vtanh.f32 %v1066_v43  ;;  %v1157_v42 = vld [vmem:[%s3275_s5 + $0xf8] sm:$0xff]  ;;  %v1156_v43 = vld [vmem:[%s3275_s5 + $0xf0] sm:$0xff] }
 0x26b   :  { %v1070_v46 = vpop.f32.mrb[54].mxu1  ;;  %1972 = vmatpush1.bf16.msra.mxu0 %v1971_v44  ;;  %v1159_v44 = vld [vmem:[%s3275_s5 + $0x108] sm:$0xff] }
 0x26c   :  { %v1071_v47 = vadd.f32 %v1070_v46, %v847_v45  ;;  %v1072_v48 = vpop.f32.mrb[55].mxu1  ;;  %1973 = vmatprep.subr.bf16.mxu0 %v2239_v28  ;;  %v2135_v49 = vpop.eup %2134  ;;  %v1158_v45 = vld [vmem:[%s3275_s5 + $0x100] sm:$0xff]  ;;  %v1161_v46 = vld [vmem:[%s3275_s5 + $0x118] sm:$0xff] }
 0x26d   :  { %v1163_v48 = vld [vmem:[%s3275_s5 + $0x128] sm:$0xff] }
 0x26e   :  { %2140 = vtanh.f32 %v1071_v47  ;;  %v1160_v47 = vld [vmem:[%s3275_s5 + $0x110] sm:$0xff] }
 0x26f   :  { %v1075_v50 = vpop.f32.mrb[56].mxu1 }
 0x270   :  { %v2137_v51 = vpop.eup %2136  ;;  %v1077_v53 = vpop.f32.mrb[57].mxu1  ;;  %v1076_v54 = vadd.f32 %v1075_v50, %v852_v52  ;;  %v1165_v50 = vld [vmem:[%s3275_s5 + $0x138] sm:$0xff]  ;;  %v1167_v52 = vld [vmem:[%s3275_s5 + $0x148] sm:$0xff] }
 0x271   :  { %v1974_v55 = vpack.c.bf16 %v2137_v51, %v2135_v49  ;;  %v1162_v49 = vld [vmem:[%s3275_s5 + $0x120] sm:$0xff]  ;;  %v1164_v51 = vld [vmem:[%s3275_s5 + $0x130] sm:$0xff] }
 0x272   :  { %2142 = vtanh.f32 %v1076_v54  ;;  %v1166_v53 = vld [vmem:[%s3275_s5 + $0x140] sm:$0xff]  ;;  %v1169_v54 = vld [vmem:[%s3275_s5 + $0x158] sm:$0xff] }
 0x273   :  { %v1080_v57 = vpop.f32.mrb[58].mxu1  ;;  %1975 = vmatpush1.bf16.msra.mxu0 %v1974_v55  ;;  %v1168_v55 = vld [vmem:[%s3275_s5 + $0x150] sm:$0xff] }
 0x274   :  { %v1081_v58 = vadd.f32 %v1080_v57, %v857_v56  ;;  %v1082_v59 = vpop.f32.mrb[59].mxu1  ;;  %1976 = vmatprep.subr.bf16.mxu0 %v2239_v28  ;;  %v2139_v60 = vpop.eup %2138  ;;  %v1171_v56 = vld [vmem:[%s3275_s5 + $0x168] sm:$0xff]  ;;  %v1170_v57 = vld [vmem:[%s3275_s5 + $0x160] sm:$0xff] }
 0x275   :  { %v1172_v59 = vld [vmem:[%s3275_s5 + $0x170] sm:$0xff] }
 0x276   :  { %2144 = vtanh.f32 %v1081_v58  ;;  %v1173_v58 = vld [vmem:[%s3275_s5 + $0x178] sm:$0xff] }
 0x277   :  { %v1085_v61 = vpop.f32.mrb[60].mxu1 }
 0x278   :  { %v2141_v62 = vpop.eup %2140  ;;  %v1087_v0 = vpop.f32.mrb[61].mxu1  ;;  %v1086_v1 = vadd.f32 %v1085_v61, %v862_v63  ;;  %v1174_v61 = vld [vmem:[%s3275_s5 + $0x180] sm:$0xff]  ;;  %v1176_v63 = vld [vmem:[%s3275_s5 + $0x190] sm:$0xff] }
 0x279   :  { %v1977_v2 = vpack.c.bf16 %v2141_v62, %v2139_v60  ;;  %v1175_v60 = vld [vmem:[%s3275_s5 + $0x188] sm:$0xff]  ;;  %v1177_v62 = vld [vmem:[%s3275_s5 + $0x198] sm:$0xff] }
 0x27a   :  { %2146 = vtanh.f32 %v1086_v1  ;;  %v1179_v0 = vld [vmem:[%s3275_s5 + $0x1a8] sm:$0xff]  ;;  %v1178_v1 = vld [vmem:[%s3275_s5 + $0x1a0] sm:$0xff] }
 0x27b   :  { %v1090_v4 = vpop.f32.mrb[62].mxu1  ;;  %1978 = vmatpush1.bf16.msra.mxu0 %v1977_v2  ;;  %v1181_v2 = vld [vmem:[%s3275_s5 + $0x1b8] sm:$0xff] }
 0x27c   :  { %v1091_v5 = vadd.f32 %v1090_v4, %v867_v3  ;;  %v1092_v6 = vpop.f32.mrb[63].mxu1  ;;  %1979 = vmatprep.subr.bf16.mxu0 %v2239_v28  ;;  %v2143_v7 = vpop.eup %2142  ;;  %v1180_v3 = vld [vmem:[%s3275_s5 + $0x1b0] sm:$0xff]  ;;  %v1183_v4 = vld [vmem:[%s3275_s5 + $0x1c8] sm:$0xff] }
 0x27d   :  { %v1185_v6 = vld [vmem:[%s3275_s5 + $0x1d8] sm:$0xff] }
 0x27e   :  { %2148 = vtanh.f32 %v1091_v5  ;;  %v1182_v5 = vld [vmem:[%s3275_s5 + $0x1c0] sm:$0xff] }
 0x280   :  { %v2145_v8 = vpop.eup %2144 }
 0x281   :  { %v1980_v9 = vpack.c.bf16 %v2145_v8, %v2143_v7  ;;  %v1184_v7 = vld [vmem:[%s3275_s5 + $0x1d0] sm:$0xff]  ;;  %v1187_v8 = vld [vmem:[%s3275_s5 + $0x1e8] sm:$0xff] }
 0x283   :  { %1981 = vmatpush1.bf16.msra.mxu0 %v1980_v9  ;;  %v1186_v9 = vld [vmem:[%s3275_s5 + $0x1e0] sm:$0xff] }
 0x284   :  { %1982 = vmatprep.subr.bf16.mxu0 %v2239_v28  ;;  %v2147_v10 = vpop.eup %2146  ;;  %v1131_v28 = vld [vmem:[%s3275_s5 + $0x28] sm:$0xff] }
 0x288   :  { %v2149_v11 = vpop.eup %2148 }
 0x289   :  { %v1983_v12 = vpack.c.bf16 %v2149_v11, %v2147_v10  ;;  %v1189_v10 = vld [vmem:[%s3275_s5 + $0x1f8] sm:$0xff]  ;;  %v1188_v11 = vld [vmem:[%s3275_s5 + $0x1f0] sm:$0xff] }
 0x28b   :  { %1984 = vmatpush1.bf16.msra.mxu0 %v1983_v12  ;;  %v3132_v12 = vpop.permute.xlu0 %1304 }
 0x28e   :  { %1447 = vmatmul.mubr.f32.vlgmr.msra.gmra.mrb[32].mxu0 %v1126_v13  ;;  %v3134_v13 = vpop.permute.xlu1 %1309 }
 0x28f   :  { %1451 = vmatprep.mubr.f32.mxu0 %v1129_v14  ;;  %v1225_v14 = vpop.permute.xlu0 %1224 }
 0x292   :  { %1452 = vmatmul.mubr.f32.gmra.mrb[34].mxu0 %v1128_v15  ;;  %v1230_v15 = vpop.permute.xlu1 %1229 }
 0x293   :  { %1456 = vmatprep.mubr.f32.mxu0 %v1131_v28  ;;  %v3136_v28 = vpop.permute.xlu0 %1314 }
 0x296   :  { %1457 = vmatmul.mubr.f32.gmra.mrb[36].mxu0 %v1130_v16  ;;  %v3138_v16 = vpop.permute.xlu1 %1319 }
 0x297   :  { %1461 = vmatprep.mubr.f32.mxu0 %v1133_v17  ;;  %v1235_v17 = vpop.permute.xlu0 %1234 }
 0x29a   :  { %1462 = vmatmul.mubr.f32.gmra.mrb[38].mxu0 %v1132_v18  ;;  %v1240_v18 = vpop.permute.xlu1 %1239 }
 0x29b   :  { %1466 = vmatprep.mubr.f32.mxu0 %v1135_v19  ;;  %v3140_v19 = vpop.permute.xlu0 %1324 }
 0x29e   :  { %1467 = vmatmul.mubr.f32.gmra.mrb[40].mxu0 %v1134_v20  ;;  %v3142_v20 = vpop.permute.xlu1 %1329 }
 0x29f   :  { %1471 = vmatprep.mubr.f32.mxu0 %v1137_v21  ;;  %v1245_v21 = vpop.permute.xlu0 %1244 }
 0x2a2   :  { %1472 = vmatmul.mubr.f32.gmra.mrb[42].mxu0 %v1136_v22  ;;  %v1250_v22 = vpop.permute.xlu1 %1249 }
 0x2a3   :  { %1476 = vmatprep.mubr.f32.mxu0 %v1139_v23 }
 0x2a6   :  { %1477 = vmatmul.mubr.f32.gmra.mrb[44].mxu0 %v1138_v24 }
 0x2a7   :  { %1481 = vmatprep.mubr.f32.mxu0 %v1141_v25 }
 0x2aa   :  { %1482 = vmatmul.mubr.f32.gmra.mrb[46].mxu0 %v1140_v26  ;;  %v3144_v26 = vpop.permute.xlu0 %1334 }
 0x2ab   :  { %1486 = vmatprep.mubr.f32.mxu0 %v1143_v27 }
 0x2ae   :  { %1487 = vmatmul.mubr.f32.gmra.mrb[48].mxu0 %v1142_v29 }
 0x2af   :  { %1491 = vmatprep.mubr.f32.mxu0 %v1145_v30 }
 0x2b2   :  { %1492 = vmatmul.mubr.f32.gmra.mrb[50].mxu0 %v1144_v31  ;;  %v3146_v31 = vpop.permute.xlu1 %1339 }
 0x2b3   :  { %1496 = vmatprep.mubr.f32.mxu0 %v1147_v32 }
 0x2b6   :  { %1497 = vmatmul.mubr.f32.gmra.mrb[52].mxu0 %v1146_v33  ;;  %v1255_v33 = vpop.permute.xlu0 %1254 }
 0x2b7   :  { %1501 = vmatprep.mubr.f32.mxu0 %v1149_v34 }
 0x2ba   :  { %1502 = vmatmul.mubr.f32.gmra.mrb[54].mxu0 %v1148_v35 }
 0x2bb   :  { %1506 = vmatprep.mubr.f32.mxu0 %v1151_v36  ;;  %v1260_v36 = vpop.permute.xlu1 %1259 }
 0x2be   :  { %1507 = vmatmul.mubr.f32.gmra.mrb[56].mxu0 %v1150_v37 }
 0x2bf   :  { %1511 = vmatprep.mubr.f32.mxu0 %v1153_v38 }
 0x2c2   :  { %1512 = vmatmul.mubr.f32.gmra.mrb[58].mxu0 %v1152_v39 }
 0x2c3   :  { %1516 = vmatprep.mubr.f32.mxu0 %v1155_v40  ;;  %v1640_v40 = vld [vmem:[%s3277_s7 + $0x8] sm:$0xff] }
 0x2c4   :  { %1711 = vmatprep.mubr.f32.mxu1 %v1640_v40 }
 0x2c6   :  { %1517 = vmatmul.mubr.f32.gmra.mrb[60].mxu0 %v1154_v41  ;;  %v3151_v41 = vpop.permute.xlu0 %1344 }
 0x2c7   :  { %1521 = vmatprep.mubr.f32.mxu0 %v1157_v42 }
 0x2ca   :  { %1522 = vmatmul.mubr.f32.gmra.mrb[62].mxu0 %v1156_v43 }
 0x2cb   :  { %1526 = vmatprep.mubr.f32.mxu0 %v1159_v44 }
 0x2ce   :  { %1527 = vmatmul.mubr.f32.gmra.mrb[64].mxu0 %v1158_v45 }
 0x2cf   :  { %1531 = vmatprep.mubr.f32.mxu0 %v1161_v46  ;;  %v3157_v46 = vpop.permute.xlu1 %1349 }
 0x2d2   :  { %1532 = vmatmul.mubr.f32.gmra.mrb[66].mxu0 %v1160_v47 }
 0x2d3   :  { %1536 = vmatprep.mubr.f32.mxu0 %v1163_v48 }
 0x2d6   :  { %1537 = vmatmul.mubr.f32.gmra.mrb[68].mxu0 %v1162_v49 }
 0x2d7   :  { %1541 = vmatprep.mubr.f32.mxu0 %v1165_v50  ;;  %v1265_v50 = vpop.permute.xlu0 %1264 }
 0x2da   :  { %1542 = vmatmul.mubr.f32.gmra.mrb[70].mxu0 %v1164_v51 }
 0x2db   :  { %1546 = vmatprep.mubr.f32.mxu0 %v1167_v52 }
 0x2de   :  { %1547 = vmatmul.mubr.f32.gmra.mrb[72].mxu0 %v1166_v53 }
 0x2df   :  { %1551 = vmatprep.mubr.f32.mxu0 %v1169_v54  ;;  %v1270_v54 = vpop.permute.xlu1 %1269 }
 0x2e2   :  { %1552 = vmatmul.mubr.f32.gmra.mrb[74].mxu0 %v1168_v55 }
 0x2e3   :  { %1556 = vmatprep.mubr.f32.mxu0 %v1171_v56 }
 0x2e6   :  { %1557 = vmatmul.mubr.f32.gmra.mrb[76].mxu0 %v1170_v57 }
 0x2e7   :  { %1561 = vmatprep.mubr.f32.mxu0 %v1173_v58 }
 0x2ea   :  { %1562 = vmatmul.mubr.f32.gmra.mrb[78].mxu0 %v1172_v59 }
 0x2eb   :  { %1566 = vmatprep.mubr.f32.mxu0 %v1175_v60  ;;  %v3167_v60 = vpop.permute.xlu0 %1354 }
 0x2ee   :  { %1567 = vmatmul.mubr.f32.gmra.mrb[80].mxu0 %v1174_v61 }
 0x2ef   :  { %1571 = vmatprep.mubr.f32.mxu0 %v1177_v62 }
 0x2f2   :  { %1572 = vmatmul.mubr.f32.gmra.mrb[82].mxu0 %v1176_v63 }
 0x2f3   :  { %1576 = vmatprep.mubr.f32.mxu0 %v1179_v0  ;;  %v3169_v0 = vpop.permute.xlu1 %1359 }
 0x2f6   :  { %1577 = vmatmul.mubr.f32.gmra.mrb[84].mxu0 %v1178_v1 }
 0x2f7   :  { %1581 = vmatprep.mubr.f32.mxu0 %v1181_v2 }
 0x2fa   :  { %1582 = vmatmul.mubr.f32.gmra.mrb[86].mxu0 %v1180_v3 }
 0x2fb   :  { %1586 = vmatprep.mubr.f32.mxu0 %v1183_v4  ;;  %v1275_v4 = vpop.permute.xlu0 %1274 }
 0x2fe   :  { %1587 = vmatmul.mubr.f32.gmra.mrb[88].mxu0 %v1182_v5 }
 0x2ff   :  { %1591 = vmatprep.mubr.f32.mxu0 %v1185_v6 }
 0x302   :  { %1592 = vmatmul.mubr.f32.gmra.mrb[90].mxu0 %v1184_v7 }
 0x303   :  { %1596 = vmatprep.mubr.f32.mxu0 %v1187_v8  ;;  %v1280_v8 = vpop.permute.xlu1 %1279 }
 0x306   :  { %1597 = vmatmul.mubr.f32.gmra.mrb[92].mxu0 %v1186_v9 }
 0x307   :  { %1601 = vmatprep.mubr.f32.mxu0 %v1189_v10 }
 0x30a   :  { %1602 = vmatmul.mubr.f32.gmra.mrb[94].mxu0 %v1188_v11 }
 0x361   :  { %v1448_v23 = vpop.f32.mrb[32].mxu0 }
 0x362   :  { %v1450_v24 = vpop.f32.mrb[33].mxu0  ;;  %v1449_v25 = vadd.f32 %v1448_v23, %v1225_v14  ;;  %v3177_v14 = vpop.permute.xlu0 %1364 }
 0x364   :  { %2150 = vtanh.f32 %v1449_v25 }
 0x365   :  { %v1453_v27 = vpop.f32.mrb[34].mxu0 }
 0x366   :  { %v1454_v29 = vadd.f32 %v1453_v27, %v1230_v15  ;;  %v1455_v30 = vpop.f32.mrb[35].mxu0  ;;  %v1285_v27 = vpop.permute.xlu0 %1284 }
 0x368   :  { %2152 = vtanh.f32 %v1454_v29 }
 0x369   :  { %v1458_v32 = vpop.f32.mrb[36].mxu0 }
 0x36a   :  { %v1460_v34 = vpop.f32.mrb[37].mxu0  ;;  %v1459_v35 = vadd.f32 %v1458_v32, %v1235_v17 }
 0x36c   :  { %2154 = vtanh.f32 %v1459_v35 }
 0x36d   :  { %v1463_v37 = vpop.f32.mrb[38].mxu0 }
 0x36e   :  { %v1464_v38 = vadd.f32 %v1463_v37, %v1240_v18  ;;  %v1465_v39 = vpop.f32.mrb[39].mxu0  ;;  %v3153_v42 = vpop.eup %2150 }
 0x36f   :  { %v3193_v39 = vpop.permute.xlu0 %1374 }
 0x370   :  { %2156 = vtanh.f32 %v1464_v38 }
 0x371   :  { %v1468_v43 = vpop.f32.mrb[40].mxu0 }
 0x372   :  { %v3155_v44 = vpop.eup %2152  ;;  %v1470_v45 = vpop.f32.mrb[41].mxu0  ;;  %v1469_v47 = vadd.f32 %v1468_v43, %v1245_v21 }
 0x373   :  { %v1987_v48 = vpack.c.bf16 %v3155_v44, %v3153_v42 }
 0x374   :  { %2158 = vtanh.f32 %v1469_v47 }
 0x375   :  { %v1473_v49 = vpop.f32.mrb[42].mxu0 }
 0x376   :  { %v1474_v51 = vadd.f32 %v1473_v49, %v1250_v22  ;;  %v1475_v52 = vpop.f32.mrb[43].mxu0  ;;  %v3161_v53 = vpop.eup %2154 }
 0x377   :  { %v3183_v22 = vpop.permute.xlu1 %1369  ;;  %v1295_v52 = vpop.permute.xlu0 %1294 }
 0x378   :  { %2160 = vtanh.f32 %v1474_v51 }
 0x379   :  { %v1478_v55 = vpop.f32.mrb[44].mxu0 }
 0x37a   :  { %v3163_v56 = vpop.eup %2156  ;;  %v1480_v57 = vpop.f32.mrb[45].mxu0  ;;  %v1479_v58 = vadd.f32 %v1478_v55, %v1255_v33 }
 0x37b   :  { %v1991_v59 = vpack.c.bf16 %v3163_v56, %v3161_v53  ;;  %v1290_v33 = vpop.permute.xlu1 %1289 }
 0x37c   :  { %2162 = vtanh.f32 %v1479_v58 }
 0x37d   :  { %v1483_v61 = vpop.f32.mrb[46].mxu0 }
 0x37e   :  { %v1484_v62 = vadd.f32 %v1483_v61, %v1260_v36  ;;  %v1485_v63 = vpop.f32.mrb[47].mxu0  ;;  %v3171_v1 = vpop.eup %2158 }
 0x37f   :  { %v3195_v47 = vpop.permute.xlu1 %1379 }
 0x380   :  { %2164 = vtanh.f32 %v1484_v62 }
 0x381   :  { %v1488_v2 = vpop.f32.mrb[48].mxu0 }
 0x382   :  { %v3173_v3 = vpop.eup %2160  ;;  %v1490_v5 = vpop.f32.mrb[49].mxu0  ;;  %v1489_v6 = vadd.f32 %v1488_v2, %v1265_v50 }
 0x383   :  { %v1995_v7 = vpack.c.bf16 %v3173_v3, %v3171_v1  ;;  %v1300_v58 = vpop.permute.xlu1 %1299 }
 0x384   :  { %2166 = vtanh.f32 %v1489_v6 }
 0x385   :  { %v1493_v9 = vpop.f32.mrb[50].mxu0 }
 0x386   :  { %v1494_v10 = vadd.f32 %v1493_v9, %v1270_v54  ;;  %v1495_v11 = vpop.f32.mrb[51].mxu0  ;;  %v3179_v15 = vpop.eup %2162 }
 0x388   :  { %2168 = vtanh.f32 %v1494_v10 }
 0x389   :  { %v1498_v17 = vpop.f32.mrb[52].mxu0 }
 0x38a   :  { %v3181_v18 = vpop.eup %2164  ;;  %v1500_v21 = vpop.f32.mrb[53].mxu0  ;;  %v1499_v23 = vadd.f32 %v1498_v17, %v1275_v4 }
 0x38b   :  { %v1999_v24 = vpack.c.bf16 %v3181_v18, %v3179_v15 }
 0x38c   :  { %2170 = vtanh.f32 %v1499_v23 }
 0x38d   :  { %v1503_v25 = vpop.f32.mrb[54].mxu0 }
 0x38e   :  { %v1504_v29 = vadd.f32 %v1503_v25, %v1280_v8  ;;  %v1505_v30 = vpop.f32.mrb[55].mxu0  ;;  %v3187_v32 = vpop.eup %2166 }
 0x390   :  { %2172 = vtanh.f32 %v1504_v29 }
 0x391   :  { %v1508_v34 = vpop.f32.mrb[56].mxu0 }
 0x392   :  { %v3189_v35 = vpop.eup %2168  ;;  %v1510_v36 = vpop.f32.mrb[57].mxu0  ;;  %v1509_v37 = vadd.f32 %v1508_v34, %v1285_v27 }
 0x393   :  { %v2003_v38 = vpack.c.bf16 %v3189_v35, %v3187_v32 }
 0x394   :  { %2174 = vtanh.f32 %v1509_v37 }
 0x395   :  { %v1513_v40 = vpop.f32.mrb[58].mxu0 }
 0x396   :  { %v1514_v43 = vadd.f32 %v1513_v40, %v1290_v33  ;;  %v1515_v45 = vpop.f32.mrb[59].mxu0  ;;  %v3197_v49 = vpop.eup %2170 }
 0x398   :  { %2176 = vtanh.f32 %v1514_v43 }
 0x399   :  { %v1518_v50 = vpop.f32.mrb[60].mxu0 }
 0x39a   :  { %v3199_v51 = vpop.eup %2172  ;;  %v1520_v54 = vpop.f32.mrb[61].mxu0  ;;  %v1519_v55 = vadd.f32 %v1518_v50, %v1295_v52 }
 0x39b   :  { %v2007_v57 = vpack.c.bf16 %v3199_v51, %v3197_v49 }
 0x39c   :  { %2178 = vtanh.f32 %v1519_v55 }
 0x39d   :  { %v1523_v61 = vpop.f32.mrb[62].mxu0 }
 0x39e   :  { %v1524_v62 = vadd.f32 %v1523_v61, %v1300_v58  ;;  %v1525_v63 = vpop.f32.mrb[63].mxu0  ;;  %v3203_v2 = vpop.eup %2174 }
 0x3a0   :  { %2180 = vtanh.f32 %v1524_v62 }
 0x3a1   :  { %v1528_v4 = vpop.f32.mrb[64].mxu0 }
 0x3a2   :  { %v3205_v5 = vpop.eup %2176  ;;  %v1530_v6 = vpop.f32.mrb[65].mxu0  ;;  %v1529_v8 = vadd.f32 %v1528_v4, %v3132_v12 }
 0x3a3   :  { %v2011_v9 = vpack.c.bf16 %v3205_v5, %v3203_v2  ;;  %v1645_v2 = vpop.permute.xlu0 %1644 }
 0x3a4   :  { %2182 = vtanh.f32 %v1529_v8 }
 0x3a5   :  { %v1533_v10 = vpop.f32.mrb[66].mxu0 }
 0x3a6   :  { %v1534_v11 = vadd.f32 %v1533_v10, %v3134_v13  ;;  %v1535_v17 = vpop.f32.mrb[67].mxu0  ;;  %v3211_v21 = vpop.eup %2178 }
 0x3a8   :  { %2184 = vtanh.f32 %v1534_v11 }
 0x3a9   :  { %v1538_v23 = vpop.f32.mrb[68].mxu0 }
 0x3aa   :  { %v3213_v25 = vpop.eup %2180  ;;  %v1540_v27 = vpop.f32.mrb[69].mxu0  ;;  %v1539_v29 = vadd.f32 %v1538_v23, %v3136_v28 }
 0x3ab   :  { %v2015_v12 = vpack.c.bf16 %v3213_v25, %v3211_v21 }
 0x3ac   :  { %2186 = vtanh.f32 %v1539_v29 }
 0x3ad   :  { %v1543_v30 = vpop.f32.mrb[70].mxu0 }
 0x3ae   :  { %v1544_v33 = vadd.f32 %v1543_v30, %v3138_v16  ;;  %v1545_v34 = vpop.f32.mrb[71].mxu0  ;;  %v2183_v13 = vpop.eup %2182 }
 0x3b0   :  { %2188 = vtanh.f32 %v1544_v33 }
 0x3b1   :  { %v1548_v36 = vpop.f32.mrb[72].mxu0 }
 0x3b2   :  { %v2185_v37 = vpop.eup %2184  ;;  %v1550_v40 = vpop.f32.mrb[73].mxu0  ;;  %v1549_v43 = vadd.f32 %v1548_v36, %v3140_v19 }
 0x3b3   :  { %v1985_v45 = vpack.c.bf16 %v2185_v37, %v2183_v13 }
 0x3b4   :  { %2190 = vtanh.f32 %v1549_v43 }
 0x3b5   :  { %v1553_v50 = vpop.f32.mrb[74].mxu0  ;;  %1986 = vmatprep.subr.bf16.mxu1 %v1985_v45 }
 0x3b6   :  { %v1554_v28 = vadd.f32 %v1553_v50, %v3142_v20  ;;  %1988 = vmatpush3.bf16.msra.mxu1 %v1987_v48  ;;  %v1555_v52 = vpop.f32.mrb[75].mxu0  ;;  %v2187_v16 = vpop.eup %2186 }
 0x3b8   :  { %2192 = vtanh.f32 %v1554_v28 }
 0x3b9   :  { %v1558_v54 = vpop.f32.mrb[76].mxu0 }
 0x3ba   :  { %v2189_v55 = vpop.eup %2188  ;;  %v1560_v58 = vpop.f32.mrb[77].mxu0  ;;  %v1559_v61 = vadd.f32 %v1558_v54, %v3144_v26 }
 0x3bb   :  { %v1989_v62 = vpack.c.bf16 %v2189_v55, %v2187_v16 }
 0x3bc   :  { %2194 = vtanh.f32 %v1559_v61 }
 0x3bd   :  { %v1563_v19 = vpop.f32.mrb[78].mxu0  ;;  %1990 = vmatprep.subr.bf16.mxu1 %v1989_v62 }
 0x3be   :  { %v1564_v63 = vadd.f32 %v1563_v19, %v3146_v31  ;;  %1992 = vmatpush3.bf16.msra.mxu1 %v1991_v59  ;;  %v1565_v20 = vpop.f32.mrb[79].mxu0  ;;  %v2191_v42 = vpop.eup %2190 }
 0x3c0   :  { %2196 = vtanh.f32 %v1564_v63 }
 0x3c1   :  { %v1568_v44 = vpop.f32.mrb[80].mxu0 }
 0x3c2   :  { %v2193_v48 = vpop.eup %2192  ;;  %v1570_v4 = vpop.f32.mrb[81].mxu0  ;;  %v1569_v6 = vadd.f32 %v1568_v44, %v3151_v41 }
 0x3c3   :  { %v1993_v8 = vpack.c.bf16 %v2193_v48, %v2191_v42 }
 0x3c4   :  { %2198 = vtanh.f32 %v1569_v6 }
 0x3c5   :  { %v1573_v26 = vpop.f32.mrb[82].mxu0  ;;  %1994 = vmatprep.subr.bf16.mxu1 %v1993_v8 }
 0x3c6   :  { %v1574_v10 = vadd.f32 %v1573_v26, %v3157_v46  ;;  %1996 = vmatpush3.bf16.msra.mxu1 %v1995_v7  ;;  %v1575_v31 = vpop.f32.mrb[83].mxu0  ;;  %v2195_v53 = vpop.eup %2194 }
 0x3c8   :  { %2200 = vtanh.f32 %v1574_v10 }
 0x3c9   :  { %v1578_v56 = vpop.f32.mrb[84].mxu0 }
 0x3ca   :  { %v2197_v59 = vpop.eup %2196  ;;  %v1580_v11 = vpop.f32.mrb[85].mxu0  ;;  %v1579_v17 = vadd.f32 %v1578_v56, %v3167_v60 }
 0x3cb   :  { %v1997_v23 = vpack.c.bf16 %v2197_v59, %v2195_v53 }
 0x3cc   :  { %2202 = vtanh.f32 %v1579_v17 }
 0x3cd   :  { %v1583_v41 = vpop.f32.mrb[86].mxu0  ;;  %1998 = vmatprep.subr.bf16.mxu1 %v1997_v23 }
 0x3ce   :  { %v1584_v27 = vadd.f32 %v1583_v41, %v3169_v0  ;;  %2000 = vmatpush3.bf16.msra.mxu1 %v1999_v24  ;;  %v1585_v46 = vpop.f32.mrb[87].mxu0  ;;  %v2199_v1 = vpop.eup %2198 }
 0x3d0   :  { %2204 = vtanh.f32 %v1584_v27 }
 0x3d1   :  { %v1588_v3 = vpop.f32.mrb[88].mxu0 }
 0x3d2   :  { %v2201_v7 = vpop.eup %2200  ;;  %v1590_v29 = vpop.f32.mrb[89].mxu0  ;;  %v1589_v30 = vadd.f32 %v1588_v3, %v3177_v14 }
 0x3d3   :  { %v2001_v33 = vpack.c.bf16 %v2201_v7, %v2199_v1 }
 0x3d4   :  { %2206 = vtanh.f32 %v1589_v30 }
 0x3d5   :  { %v1593_v60 = vpop.f32.mrb[90].mxu0  ;;  %2002 = vmatprep.subr.bf16.mxu1 %v2001_v33 }
 0x3d6   :  { %v1594_v34 = vadd.f32 %v1593_v60, %v3183_v22  ;;  %2004 = vmatpush3.bf16.msra.mxu1 %v2003_v38  ;;  %v1595_v0 = vpop.f32.mrb[91].mxu0  ;;  %v2203_v15 = vpop.eup %2202 }
 0x3d8   :  { %2208 = vtanh.f32 %v1594_v34 }
 0x3d9   :  { %v1598_v18 = vpop.f32.mrb[92].mxu0 }
 0x3da   :  { %v2205_v24 = vpop.eup %2204  ;;  %v1600_v13 = vpop.f32.mrb[93].mxu0  ;;  %v1599_v36 = vadd.f32 %v1598_v18, %v3193_v39 }
 0x3db   :  { %v2005_v37 = vpack.c.bf16 %v2205_v24, %v2203_v15 }
 0x3dc   :  { %2210 = vtanh.f32 %v1599_v36 }
 0x3dd   :  { %v1603_v14 = vpop.f32.mrb[94].mxu0  ;;  %2006 = vmatprep.subr.bf16.mxu1 %v2005_v37 }
 0x3de   :  { %v1604_v40 = vadd.f32 %v1603_v14, %v3195_v47  ;;  %2008 = vmatpush3.bf16.msra.mxu1 %v2007_v57  ;;  %v1605_v22 = vpop.f32.mrb[95].mxu0  ;;  %v2207_v32 = vpop.eup %2206  ;;  %v1639_v47 = vld [vmem:[%s3277_s7] sm:$0xff] }
 0x3e0   :  { %2212 = vtanh.f32 %v1604_v40 }
 0x3e2   :  { %v2209_v35 = vpop.eup %2208 }
 0x3e3   :  { %v2009_v38 = vpack.c.bf16 %v2209_v35, %v2207_v32 }
 0x3e5   :  { %2010 = vmatprep.subr.bf16.mxu1 %v2009_v38 }
 0x3e6   :  { %2012 = vmatpush3.bf16.msra.mxu1 %v2011_v9  ;;  %v2211_v39 = vpop.eup %2210 }
 0x3ea   :  { %v2213_v43 = vpop.eup %2212 }
 0x3eb   :  { %v2013_v45 = vpack.c.bf16 %v2213_v43, %v2211_v39 }
 0x3ed   :  { %2014 = vmatprep.subr.bf16.mxu1 %v2013_v45 }
 0x3ee   :  { %2016 = vmatpush3.bf16.msra.mxu1 %v2015_v12 }
 0x3f1   :  { %1712 = vmatmul.mubr.f32.vlgmr.msra.gmra.mrb[64].mxu1 %v1639_v47 }
 0x4c4   :  { %v1830_v49 = vpop.f32.mrb[64].mxu1 }
 0x4c5   :  { %v1831_v51 = vpop.f32.mrb[65].mxu1 }
 0x4c6   :  { %v1832_v57 = vadd.f32 %v1831_v51, %v1830_v49 }
 0x4c8   :  { %v1714_v5 = vadd.f32 %v1832_v57, %v1645_v2 }
 0x4ca   :  { %1717 = vst [vmem:[#allocation2] sm:$0xff] %v1714_v5 }
 0x4cb   :  { %2225 = shalt.err (!%p2222_p4)
}
 0x4cc   :  { %s2226_s7 = scalar_lea.hbm %s3279_s9, 128 }
 0x4cd   :  { %p2227_p5 = scmp.ne.s32.totalorder %s3279_s9, %s2226_s7  ;;  %p2230_p6 = scmp.lt.u32.totalorder %s2226_s7, %s3279_s9 }
 0x4cf   :  { %p2232_p7 = pnand %p2230_p6, %p2227_p5 }
 0x4d1   :  { %2235 = shalt.err (!%p2232_p7)
}
 0x4d2   :  { %1727 = dma.vmem_to_hbm [thread:$0]  %s1725_s23, 128, %s3279_s9, [#allocation3]  }
 0x4d3   :  { %2236 = dma.done.wait [#allocation3], 128  }
 0x4d4   :  { %2237 = vsyncadd [#allocation3], 4294967168 }
 0x4d5   :  { %1731 = vsyncpa [#allocation3], 1 }

</bundles_post_ra>
